<compile_context>
chip_gen: v7x
topology: tpu7x:2x2x1
jax: 0.10.0
libtpu: 0.0.40
codegen_flags: <defaults>
</compile_context>

<pallas_src>
import functools

import numpy as np
import jax
import jax.numpy as jnp
from jax.experimental import pallas as pl
from jax.experimental.pallas import tpu as pltpu


# ----------------------------- config ---------------------------------------
class Cfg:
    roi_pool_h = 8
    roi_pool_w = 8
    out_feature_num = 32          # feature channels == head hidden channels
    class_num = 4
    max_obj = 16
    nms_thresh = 0.5
    min_area = 4.0
    train_box_iou_thre = 0.7
    loss_parts = ("heatmap", "offset", "width_height")
    loss_weight = (1.0, 1.0, 0.1)


CFG = Cfg()
TOPK = 100       # same hard-coded k as RoICenterNet.postprocess
_PAD_OFF = 8     # sublane-tile-aligned interior offset inside the NMS scratch


# -------------------- fused Pallas kernel: heads + sigmoid + point-NMS -------
def _fused_heads_kernel(x_ref, w1_ref, b1_ref, w2_ref, b2_ref,
                        pred_ref, nms_ref, pad_ref, *, num_class, ph, pw):
    # CenterNet heads: Conv3x3 (im2col) -> ReLU -> Conv1x1, all three heads
    # fused into two MXU matmuls (bf16 operands, f32 accumulation).
    h = jnp.dot(x_ref[...], w1_ref[...], preferred_element_type=jnp.float32)
    h = jnp.maximum(h + b1_ref[...], 0.0)
    y = jnp.dot(h.astype(w2_ref.dtype), w2_ref[...],
                preferred_element_type=jnp.float32) + b2_ref[...]

    # Sigmoid epilogue on all 128 lanes (the heatmap lives in lanes [0, K);
    # the padded lanes ride along for free on the same vregs).
    p = 1.0 / (1.0 + jnp.exp(-y))

    tm, lanes = y.shape
    tr = tm // (ph * pw)
    p4 = p.reshape(tr, ph, pw, lanes)                 # (ROIs, Ph, Pw, lanes)

    # 3x3 point-NMS (max-pool, stride 1, pad 1) computed separably
    # (row-max over Pw, then col-max over Ph).  The -1 filled scratch supplies
    # the spatial padding; both interior stores are sublane-tile aligned, the
    # +/-1 Pw windows are value-level slices of one windowed load.
    pad_ref[...] = jnp.full(pad_ref.shape, -1.0, dtype=pad_ref.dtype)
    pad_ref[:, 1:ph + 1, _PAD_OFF:_PAD_OFF + pw, :] = p4
    row = pad_ref[:, 1:ph + 1, :, :]                  # (tr, ph, padded_pw, lanes)
    m1 = jnp.maximum(
        jnp.maximum(row[:, :, _PAD_OFF - 1:_PAD_OFF - 1 + pw, :],
                    row[:, :, _PAD_OFF:_PAD_OFF + pw, :]),
        row[:, :, _PAD_OFF + 1:_PAD_OFF + 1 + pw, :])
    pad_ref[:, 1:ph + 1, _PAD_OFF:_PAD_OFF + pw, :] = m1
    hmax = jnp.maximum(
        jnp.maximum(pad_ref[:, 0:ph, _PAD_OFF:_PAD_OFF + pw, :],
                    pad_ref[:, 1:ph + 1, _PAD_OFF:_PAD_OFF + pw, :]),
        pad_ref[:, 2:ph + 2, _PAD_OFF:_PAD_OFF + pw, :])
    keep = (hmax == p4).astype(p.dtype)
    nms = (p4 * keep).reshape(tm, lanes)

    # Lanes [0, K): sigmoided heatmap; lanes [K, K+4): raw offset/width_height;
    # the remaining (padded) lanes are zeros / don't-cares, sliced off outside.
    lane = jax.lax.broadcasted_iota(jnp.int32, (tm, lanes), 1)
    pred_ref[...] = jnp.where(lane < num_class, p, y)
    nms_ref[...] = nms


def _choose_row_tile(num_rows, rows_per_roi):
    """Rows per grid step (whole ROIs): one step on v5e/v6e (single TC), two
    parallel steps on v7x (two TCs), capped so blocks stay tiny in VMEM."""
    kind = ""
    try:
        kind = jax.devices()[0].device_kind.lower()
    except Exception:
        pass
    cap = 512
    if "v7" in kind or "7x" in kind:
        tile = pl.cdiv(pl.cdiv(num_rows, 2), rows_per_roi) * rows_per_roi
    else:
        tile = pl.cdiv(num_rows, rows_per_roi) * rows_per_roi
    return int(max(rows_per_roi, min(tile, cap)))


def centernet_heads_postprocess(rois, params, cfg):
    """Fused heads + sigmoid + point-NMS.  rois: [R, C, Ph, Pw] NCHW."""
    R, C, PH, PW = rois.shape
    K = cfg.class_num
    rows_per_roi = PH * PW
    HIDP = params["W1"].shape[1]                       # padded hidden (96 -> 128)
    OUTP = params["W2"].shape[1]                       # padded/lane-dense out (8 -> 128)

    # im2col (3x3, padding=1) in NHWC, bf16 operands for the MXU.
    # TODO(synk): for large R move im2col inside the kernel (per-ROI padded
    # tile + shifted sublane views) to avoid the 9x-expanded HBM round trip.
    x = jnp.transpose(rois, (0, 2, 3, 1)).astype(jnp.bfloat16)
    xp = jnp.pad(x, ((0, 0), (1, 1), (1, 1), (0, 0)))
    cols = [xp[:, di:di + PH, dj:dj + PW, :] for di in range(3) for dj in range(3)]
    patches = jnp.concatenate(cols, axis=-1).reshape(R * rows_per_roi, 9 * C)

    M = R * rows_per_roi
    TM = _choose_row_tile(M, rows_per_roi)
    Mpad = pl.cdiv(M, TM) * TM
    if Mpad != M:
        patches = jnp.pad(patches, ((0, Mpad - M), (0, 0)))
    TR = TM // rows_per_roi

    kernel = functools.partial(_fused_heads_kernel, num_class=K, ph=PH, pw=PW)
    pred, nms = pl.pallas_call(
        kernel,
        out_shape=(
            jax.ShapeDtypeStruct((Mpad, OUTP), jnp.float32),
            jax.ShapeDtypeStruct((Mpad, OUTP), jnp.float32),
        ),
        grid_spec=pltpu.PrefetchScalarGridSpec(
            num_scalar_prefetch=0,
            grid=(Mpad // TM,),
            in_specs=[
                pl.BlockSpec((TM, 9 * C), lambda i: (i, 0)),
                pl.BlockSpec((9 * C, HIDP), lambda i: (0, 0)),
                pl.BlockSpec((1, HIDP), lambda i: (0, 0)),
                pl.BlockSpec((HIDP, OUTP), lambda i: (0, 0)),
                pl.BlockSpec((1, OUTP), lambda i: (0, 0)),
            ],
            out_specs=[
                pl.BlockSpec((TM, OUTP), lambda i: (i, 0)),
                pl.BlockSpec((TM, OUTP), lambda i: (i, 0)),
            ],
            scratch_shapes=[
                pltpu.VMEM((TR, PH + 2, _PAD_OFF + PW + 8, OUTP), jnp.float32),
            ],
        ),
        compiler_params=pltpu.CompilerParams(dimension_semantics=("parallel",)),
    )(patches, params["W1"], params["b1"], params["W2"], params["b2"])

    pred = pred[:M].reshape(R, PH, PW, OUTP)           # drop padded rows
    nms = nms[:M].reshape(R, PH, PW, OUTP)
    heatmap = jnp.transpose(pred[..., :K], (0, 3, 1, 2))             # sigmoided, NCHW
    offset = jnp.transpose(pred[..., K:K + 2], (0, 3, 1, 2))
    width_height = jnp.transpose(pred[..., K + 2:K + 4], (0, 3, 1, 2))
    heat_nms = jnp.transpose(nms[..., :K], (0, 3, 1, 2))             # point_nms(sigmoid(hm))
    return heatmap, heat_nms, offset, width_height


# ------------------------------ JAX glue -------------------------------------
def _bilinear_axis_weights(start, bin_size, pool, size):
    """Separable bilinear interpolation weights (N, pool, size), sampling_ratio=1."""
    centers = start[:, None] + (jnp.arange(pool, dtype=jnp.float32) + 0.5) * bin_size[:, None]
    valid = (centers >= -1.0) & (centers <= float(size))
    pts = jnp.clip(centers, 0.0, float(size - 1))
    lo = jnp.floor(pts)
    frac = pts - lo
    lo_i = lo.astype(jnp.int32)
    hi_i = jnp.minimum(lo_i + 1, size - 1)
    grid = jnp.arange(size, dtype=jnp.int32)
    w = ((grid[None, None, :] == lo_i[:, :, None]).astype(jnp.float32) * (1.0 - frac)[:, :, None]
         + (grid[None, None, :] == hi_i[:, :, None]).astype(jnp.float32) * frac[:, :, None])
    return jnp.where(valid[:, :, None], w, 0.0)


def roi_align_batch(features, proposals, stride, pool_h, pool_w):
    """torchvision-style ROIAlign (aligned=False) as one-hot weight matmuls
    (no 4-D gathers; interpolation runs on the MXU)."""
    # TODO(synk): sampling_ratio=-1 (adaptive, data-dependent #samples per bin)
    # has no static-shape equivalent; one bilinear sample per bin center is used.
    spatial_scale = 1.0 / float(stride)
    _, C, Hf, Wf = features.shape
    outs = []
    for b in range(len(proposals)):
        boxes = proposals[b].astype(jnp.float32)
        fm = features[b]                                         # [C, Hf, Wf]
        x1 = boxes[:, 0] * spatial_scale
        y1 = boxes[:, 1] * spatial_scale
        x2 = boxes[:, 2] * spatial_scale
        y2 = boxes[:, 3] * spatial_scale
        bin_w = jnp.maximum(x2 - x1, 1.0) / pool_w
        bin_h = jnp.maximum(y2 - y1, 1.0) / pool_h
        wx = _bilinear_axis_weights(x1, bin_w, pool_w, Wf)       # (N, Pw, Wf)
        wy = _bilinear_axis_weights(y1, bin_h, pool_h, Hf)       # (N, Ph, Hf)
        tmp = jnp.einsum("nph,chw->npcw", wy, fm)                # (N, Ph, C, Wf)
        val = jnp.einsum("npcw,nqw->ncpq", tmp, wx)              # (N, C, Ph, Pw)
        outs.append(val)
    return jnp.concatenate(outs, axis=0)


def topk_ind(heat, k):
    R, K, H, W = heat.shape
    flat = heat.reshape(R, K * H * W)
    scores, inds = jax.lax.top_k(flat, k)
    categories = inds // (H * W)
    inds_hw = inds % (H * W)
    ys = (inds_hw // W).astype(jnp.float32)
    xs = (inds_hw % W).astype(jnp.float32)
    return scores, categories, ys, xs, inds_hw


def decode_by_ind(feat, inds):
    R, C2, H, W = feat.shape
    return jnp.take_along_axis(feat.reshape(R, C2, H * W), inds[:, None, :], axis=2)


def recover_roi_boxes(xs, ys, offset, width_height, down_stride, roi_boxes,
                      roi_pool_h, roi_pool_w):
    # Tiny elementwise math: plain XLA (a Pallas kernel here is pure launch overhead).
    del down_stride                                   # unused, as in the reference
    roi_w = roi_boxes[:, 2] - roi_boxes[:, 0]
    roi_h = roi_boxes[:, 3] - roi_boxes[:, 1]
    w_scale = (roi_w / roi_pool_w)[:, None]
    h_scale = (roi_h / roi_pool_h)[:, None]
    cx = (xs + offset[:, 0, :]) * w_scale
    cy = (ys + offset[:, 1, :]) * h_scale
    w = width_height[:, 0, :] * w_scale
    h = width_height[:, 1, :] * h_scale
    rx1 = roi_boxes[:, 0][:, None]
    ry1 = roi_boxes[:, 1][:, None]
    x1 = cx - w * 0.5 + rx1
    y1 = cy - h * 0.5 + ry1
    x2 = cx + w * 0.5 + rx1
    y2 = cy + h * 0.5 + ry1
    return jnp.stack([x1, y1, x2, y2], axis=2)        # [R, k, 4]


def roi_centernet_forward(features, proposals, stride, params, cfg):
    """Inference path of RoICenterNet.forward (proposals given, eval mode)."""
    rois = roi_align_batch(features, proposals, stride, cfg.roi_pool_h, cfg.roi_pool_w)
    heatmap_out, heat_nms, offset_map, wh_map = centernet_heads_postprocess(rois, params, cfg)

    k = min(TOPK, cfg.class_num * cfg.roi_pool_h * cfg.roi_pool_w)
    scores, categories, ys, xs, inds = topk_ind(heat_nms, k)
    offset = decode_by_ind(offset_map, inds)
    width_height = decode_by_ind(wh_map, inds)
    roi_boxes = jnp.concatenate(proposals, axis=0)
    boxes = recover_roi_boxes(xs, ys, offset, width_height, stride, roi_boxes,
                              cfg.roi_pool_h, cfg.roi_pool_w)
    categories = categories + 1
    return heatmap_out, offset, width_height, boxes, scores, categories


# ------------------- host-side (numpy) NMS glue ------------------------------
# TODO(synk): greedy batched NMS (merge_roi_boxes) is variable-length and
# data-dependent; it is done host-side in numpy rather than in a Pallas kernel.
def _nms_numpy(boxes, scores, iou_thr):
    order = np.argsort(-scores, kind="stable")
    areas = (boxes[:, 2] - boxes[:, 0]) * (boxes[:, 3] - boxes[:, 1])
    keep = []
    while order.size > 0:
        i = order[0]
        keep.append(i)
        if order.size == 1:
            break
        rest = order[1:]
        xx1 = np.maximum(boxes[i, 0], boxes[rest, 0])
        yy1 = np.maximum(boxes[i, 1], boxes[rest, 1])
        xx2 = np.minimum(boxes[i, 2], boxes[rest, 2])
        yy2 = np.minimum(boxes[i, 3], boxes[rest, 3])
        inter = np.clip(xx2 - xx1, 0, None) * np.clip(yy2 - yy1, 0, None)
        iou = inter / (areas[i] + areas[rest] - inter + 1e-12)
        order = rest[iou <= iou_thr]
    return np.array(keep, dtype=np.int64)


def _batched_nms_numpy(boxes, scores, labels, iou_threshold):
    if boxes.shape[0] == 0:
        return np.zeros((0,), dtype=np.int64)
    max_coord = boxes.max()
    offsets = labels.astype(boxes.dtype) * (max_coord + 1.0)
    return _nms_numpy(boxes + offsets[:, None], scores, iou_threshold)


def merge_roi_boxes_host(boxes, labels, scores, iou_threshold=0.5):
    boxes_all, labels_all, scores_all = [], [], []
    for boxes_im, labels_im, scores_im in zip(boxes, labels, scores):
        boxes_im = np.asarray(boxes_im).reshape(-1, 4)
        labels_im = np.asarray(labels_im).reshape(-1)
        scores_im = np.asarray(scores_im).reshape(-1)
        keep = _batched_nms_numpy(boxes_im, scores_im, labels_im, iou_threshold)
        boxes_all.append(boxes_im[keep])
        labels_all.append(labels_im[keep])
        scores_all.append(scores_im[keep])
    return boxes_all, labels_all, scores_all


# ------------------------ deterministic parameter init -----------------------
def init_head_params(key, cfg, in_channels):
    hidden = cfg.out_feature_num
    K = cfg.class_num
    OUT = K + 4
    HIDP = pl.cdiv(max(3 * hidden, 128), 128) * 128   # 96 -> 128 (MXU aligned)
    OUTP = pl.cdiv(max(OUT, 128), 128) * 128          # 8  -> 128 (lane dense)
    ks = jax.random.split(key, 6)
    s = 0.05
    # 3x3 convs in im2col form [9*C_in, hidden] (row order: (kh, kw, c_in)).
    W1_hm = jax.random.normal(ks[0], (9 * in_channels, hidden), jnp.float32) * s
    W1_of = jax.random.normal(ks[1], (9 * in_channels, hidden), jnp.float32) * s
    W1_wh = jax.random.normal(ks[2], (9 * in_channels, hidden), jnp.float32) * s
    W2_hm = jax.random.normal(ks[3], (hidden, K), jnp.float32) * s
    W2_of = jax.random.normal(ks[4], (hidden, 2), jnp.float32) * s
    W2_wh = jax.random.normal(ks[5], (hidden, 2), jnp.float32) * s
    W1 = jnp.zeros((9 * in_channels, HIDP), jnp.float32)
    W1 = W1.at[:, 0:hidden].set(W1_hm)
    W1 = W1.at[:, hidden:2 * hidden].set(W1_of)
    W1 = W1.at[:, 2 * hidden:3 * hidden].set(W1_wh)
    b1 = jnp.zeros((1, HIDP), jnp.float32)
    W2 = jnp.zeros((HIDP, OUTP), jnp.float32)         # block-diagonal 1x1 convs + zero pad
    W2 = W2.at[0:hidden, 0:K].set(W2_hm)
    W2 = W2.at[hidden:2 * hidden, K:K + 2].set(W2_of)
    W2 = W2.at[2 * hidden:3 * hidden, K + 2:K + 4].set(W2_wh)
    b2 = jnp.zeros((1, OUTP), jnp.float32).at[0, 0:K].set(-2.19)   # CenterNet hm bias
    return {"W1": W1.astype(jnp.bfloat16), "b1": b1,
            "W2": W2.astype(jnp.bfloat16), "b2": b2}


# ----------------------------------- main ------------------------------------
if __name__ == "__main__":
    # TODO(synk): training path (generate_targets with random margins, numpy
    # gaussian-heatmap generation, CenterNetLoss) is host-side/random and is
    # not implemented; this script runs the eval/inference forward path.
    cfg = CFG
    stride = 4
    B = 2
    C = cfg.out_feature_num                      # feature channels
    Hf = Wf = 16                                 # feature-map spatial size

    key = jax.random.PRNGKey(0)
    k_feat, k_prm = jax.random.split(key)
    features = jax.random.normal(k_feat, (B, C, Hf, Wf), dtype=jnp.float32)
    # proposals in image coordinates (image = stride * feature size = 64x64)
    proposals = [
        jnp.array([[2.0, 3.0, 40.0, 50.0],
                   [10.0, 8.0, 60.0, 62.0]], dtype=jnp.float32),
        jnp.array([[0.0, 0.0, 63.0, 63.0],
                   [5.0, 20.0, 55.0, 60.0]], dtype=jnp.float32),
    ]
    params = init_head_params(k_prm, cfg, C)

    @jax.jit
    def run(features, proposals):
        return roi_centernet_forward(features, proposals, stride, params, cfg)

    outs = jax.block_until_ready(run(features, proposals))
    heatmap_out, offset, width_height, boxes, scores, categories = outs

    roi_per_pic = [int(p.shape[0]) for p in proposals]
    R_total = sum(roi_per_pic)
    k = min(TOPK, cfg.class_num * cfg.roi_pool_h * cfg.roi_pool_w)

    # shape sanity checks (mirror the PyTorch result dict shapes)
    assert np.asarray(heatmap_out).shape == (R_total, cfg.class_num, cfg.roi_pool_h, cfg.roi_pool_w)
    assert np.asarray(offset).shape == (R_total, 2, k)
    assert np.asarray(width_height).shape == (R_total, 2, k)
    assert np.asarray(boxes).shape == (R_total, k, 4)
    assert np.asarray(scores).shape == (R_total, k)
    assert np.asarray(categories).shape == (R_total, k)
    assert np.isfinite(np.asarray(boxes)).all()
    assert np.isfinite(np.asarray(heatmap_out)).all()

    # split per image and run class-aware NMS (merge_roi_boxes) on host
    splits = np.cumsum(roi_per_pic)[:-1]
    boxes_split = np.split(np.asarray(boxes), splits, axis=0)
    cats_split = np.split(np.asarray(categories), splits, axis=0)
    scores_split = np.split(np.asarray(scores), splits, axis=0)
    boxes_all, labels_all, scores_all = merge_roi_boxes_host(
        boxes_split, cats_split, scores_split, iou_threshold=cfg.nms_thresh)

    result = {
        "heatmap": heatmap_out,
        "offset": offset,
        "width_height": width_height,
        "boxes": boxes_all,
        "scores": scores_all,
        "labels": labels_all,
    }
    assert len(result["boxes"]) == B and all(b.shape[1] == 4 for b in result["boxes"])

    print("KERNEL_OK")
</pallas_src>

<mosaic_0001>
module attributes {stable_mosaic.version = 11 : i64} {
  func.func @_fused_heads_kernel(%arg0: i32, %arg1: memref<256x288xbf16, #tpu.memory_space<vmem>>, %arg2: memref<288x128xbf16, #tpu.memory_space<vmem>>, %arg3: memref<1x128xf32, #tpu.memory_space<vmem>>, %arg4: memref<128x128xbf16, #tpu.memory_space<vmem>>, %arg5: memref<1x128xf32, #tpu.memory_space<vmem>>, %arg6: memref<256x128xf32, #tpu.memory_space<vmem>>, %arg7: memref<256x128xf32, #tpu.memory_space<vmem>>, %arg8: memref<4x10x24x128xf32, #tpu.memory_space<vmem>>) attributes {dimension_semantics = [#tpu.dimension_semantics<parallel>], iteration_bounds = array<i64: 1>, scalar_prefetch = 0 : i64, scratch_operands = 1 : i64, tpu.core_type = #tpu.core_type<tc>, window_params = [{transform_indices = @transform_0, window_bounds = array<i64: 256, 288>}, {pipeline_mode = #tpu.pipeline_mode<synchronous>, transform_indices = @transform_1, window_bounds = array<i64: 288, 128>}, {pipeline_mode = #tpu.pipeline_mode<synchronous>, transform_indices = @transform_2, window_bounds = array<i64: 1, 128>}, {pipeline_mode = #tpu.pipeline_mode<synchronous>, transform_indices = @transform_3, window_bounds = array<i64: 128, 128>}, {pipeline_mode = #tpu.pipeline_mode<synchronous>, transform_indices = @transform_4, window_bounds = array<i64: 1, 128>}, {transform_indices = @transform_5, window_bounds = array<i64: 256, 128>}, {transform_indices = @transform_6, window_bounds = array<i64: 256, 128>}]} {
    %c0 = arith.constant 0 : index
    %c0_0 = arith.constant 0 : index
    %0 = vector.load %arg1[%c0, %c0_0] : memref<256x288xbf16, #tpu.memory_space<vmem>>, vector<256x288xbf16>
    %c0_1 = arith.constant 0 : index
    %c0_2 = arith.constant 0 : index
    %1 = vector.load %arg2[%c0_1, %c0_2] : memref<288x128xbf16, #tpu.memory_space<vmem>>, vector<288x128xbf16>
    %cst = arith.constant dense<0.000000e+00> : vector<256x128xf32>
    %2 = tpu.matmul %0, %1, %cst {dimension_numbers = #tpu.dot_dimension_numbers<[1], [0], [0], [1], [0, 0, 1, 1], [], []>} : vector<256x288xbf16>, vector<288x128xbf16>, vector<256x128xf32> -> vector<256x128xf32>
    %c0_3 = arith.constant 0 : index
    %c0_4 = arith.constant 0 : index
    %3 = vector.load %arg3[%c0_3, %c0_4] : memref<1x128xf32, #tpu.memory_space<vmem>>, vector<1x128xf32>
    %4 = vector.broadcast %3 : vector<1x128xf32> to vector<256x128xf32>
    %5 = arith.addf %2, %4 : vector<256x128xf32>
    %cst_5 = arith.constant 0.000000e+00 : f32
    %6 = vector.broadcast %cst_5 : f32 to vector<256x128xf32>
    %7 = arith.maximumf %5, %6 : vector<256x128xf32>
    %8 = arith.truncf %7 : vector<256x128xf32> to vector<256x128xbf16>
    %c0_6 = arith.constant 0 : index
    %c0_7 = arith.constant 0 : index
    %9 = vector.load %arg4[%c0_6, %c0_7] : memref<128x128xbf16, #tpu.memory_space<vmem>>, vector<128x128xbf16>
    %cst_8 = arith.constant dense<0.000000e+00> : vector<256x128xf32>
    %10 = tpu.matmul %8, %9, %cst_8 {dimension_numbers = #tpu.dot_dimension_numbers<[1], [0], [0], [1], [0, 0, 1, 1], [], []>} : vector<256x128xbf16>, vector<128x128xbf16>, vector<256x128xf32> -> vector<256x128xf32>
    %c0_9 = arith.constant 0 : index
    %c0_10 = arith.constant 0 : index
    %11 = vector.load %arg5[%c0_9, %c0_10] : memref<1x128xf32, #tpu.memory_space<vmem>>, vector<1x128xf32>
    %12 = vector.broadcast %11 : vector<1x128xf32> to vector<256x128xf32>
    %13 = arith.addf %10, %12 : vector<256x128xf32>
    %cst_11 = arith.constant 0.000000e+00 : f32
    %14 = vector.broadcast %cst_11 : f32 to vector<256x128xf32>
    %15 = arith.subf %14, %13 : vector<256x128xf32>
    %16 = math.exp %15 : vector<256x128xf32>
    %cst_12 = arith.constant 1.000000e+00 : f32
    %17 = vector.broadcast %cst_12 : f32 to vector<256x128xf32>
    %18 = arith.addf %17, %16 : vector<256x128xf32>
    %cst_13 = arith.constant 1.000000e+00 : f32
    %19 = vector.broadcast %cst_13 : f32 to vector<256x128xf32>
    %20 = arith.divf %19, %18 : vector<256x128xf32>
    %21 = vector.shape_cast %20 : vector<256x128xf32> to vector<4x8x8x128xf32>
    %cst_14 = arith.constant -1.000000e+00 : f32
    %22 = vector.broadcast %cst_14 : f32 to vector<4x10x24x128xf32>
    %c0_15 = arith.constant 0 : index
    %c0_16 = arith.constant 0 : index
    %c0_17 = arith.constant 0 : index
    %c0_18 = arith.constant 0 : index
    %23 = vector.load %arg8[%c0_15, %c0_16, %c0_17, %c0_18] : memref<4x10x24x128xf32, #tpu.memory_space<vmem>>, vector<4x10x24x128xf32>
    tpu.vector_store %arg8[%c0_15, %c0_16, %c0_17, %c0_18], %22 {strides = array<i32>} : memref<4x10x24x128xf32, #tpu.memory_space<vmem>>, vector<4x10x24x128xf32>,
    %c0_19 = arith.constant 0 : index
    %c1 = arith.constant 1 : index
    %c8 = arith.constant 8 : index
    %c0_20 = arith.constant 0 : index
    %24 = vector.load %arg8[%c0_19, %c1, %c8, %c0_20] : memref<4x10x24x128xf32, #tpu.memory_space<vmem>>, vector<4x8x8x128xf32>
    tpu.vector_store %arg8[%c0_19, %c1, %c8, %c0_20], %21 {strides = array<i32>} : memref<4x10x24x128xf32, #tpu.memory_space<vmem>>, vector<4x8x8x128xf32>,
    %c0_21 = arith.constant 0 : index
    %c1_22 = arith.constant 1 : index
    %c0_23 = arith.constant 0 : index
    %c0_24 = arith.constant 0 : index
    %25 = vector.load %arg8[%c0_21, %c1_22, %c0_23, %c0_24] : memref<4x10x24x128xf32, #tpu.memory_space<vmem>>, vector<4x8x24x128xf32>
    %26 = vector.extract_strided_slice %25 {offsets = [0, 0, 7, 0], sizes = [4, 8, 8, 128], strides = [1, 1, 1, 1]} : vector<4x8x24x128xf32> to vector<4x8x8x128xf32>
    %27 = vector.extract_strided_slice %25 {offsets = [0, 0, 8, 0], sizes = [4, 8, 8, 128], strides = [1, 1, 1, 1]} : vector<4x8x24x128xf32> to vector<4x8x8x128xf32>
    %28 = arith.maximumf %26, %27 : vector<4x8x8x128xf32>
    %29 = vector.extract_strided_slice %25 {offsets = [0, 0, 9, 0], sizes = [4, 8, 8, 128], strides = [1, 1, 1, 1]} : vector<4x8x24x128xf32> to vector<4x8x8x128xf32>
    %30 = arith.maximumf %28, %29 : vector<4x8x8x128xf32>
    %c0_25 = arith.constant 0 : index
    %c1_26 = arith.constant 1 : index
    %c8_27 = arith.constant 8 : index
    %c0_28 = arith.constant 0 : index
    %31 = vector.load %arg8[%c0_25, %c1_26, %c8_27, %c0_28] : memref<4x10x24x128xf32, #tpu.memory_space<vmem>>, vector<4x8x8x128xf32>
    tpu.vector_store %arg8[%c0_25, %c1_26, %c8_27, %c0_28], %30 {strides = array<i32>} : memref<4x10x24x128xf32, #tpu.memory_space<vmem>>, vector<4x8x8x128xf32>,
    %c0_29 = arith.constant 0 : index
    %c0_30 = arith.constant 0 : index
    %c8_31 = arith.constant 8 : index
    %c0_32 = arith.constant 0 : index
    %32 = vector.load %arg8[%c0_29, %c0_30, %c8_31, %c0_32] : memref<4x10x24x128xf32, #tpu.memory_space<vmem>>, vector<4x8x8x128xf32>
    %c0_33 = arith.constant 0 : index
    %c1_34 = arith.constant 1 : index
    %c8_35 = arith.constant 8 : index
    %c0_36 = arith.constant 0 : index
    %33 = vector.load %arg8[%c0_33, %c1_34, %c8_35, %c0_36] : memref<4x10x24x128xf32, #tpu.memory_space<vmem>>, vector<4x8x8x128xf32>
    %34 = arith.maximumf %32, %33 : vector<4x8x8x128xf32>
    %c0_37 = arith.constant 0 : index
    %c2 = arith.constant 2 : index
    %c8_38 = arith.constant 8 : index
    %c0_39 = arith.constant 0 : index
    %35 = vector.load %arg8[%c0_37, %c2, %c8_38, %c0_39] : memref<4x10x24x128xf32, #tpu.memory_space<vmem>>, vector<4x8x8x128xf32>
    %36 = arith.maximumf %34, %35 : vector<4x8x8x128xf32>
    %37 = arith.cmpf oeq, %36, %21 : vector<4x8x8x128xf32>
    %38 = arith.extui %37 : vector<4x8x8x128xi1> to vector<4x8x8x128xi32>
    %39 = arith.sitofp %38 : vector<4x8x8x128xi32> to vector<4x8x8x128xf32>
    %40 = arith.mulf %21, %39 : vector<4x8x8x128xf32>
    %41 = vector.shape_cast %40 : vector<4x8x8x128xf32> to vector<256x128xf32>
    %42 = tpu.iota {dimensions = array<i32: 1>} : vector<256x128xi32>
    %c4_i32 = arith.constant 4 : i32
    %43 = vector.broadcast %c4_i32 : i32 to vector<256x128xi32>
    %44 = arith.cmpi slt, %42, %43 : vector<256x128xi32>
    %45 = arith.select %44, %20, %13 : vector<256x128xi1>, vector<256x128xf32>
    %c0_40 = arith.constant 0 : index
    %c0_41 = arith.constant 0 : index
    %46 = vector.load %arg6[%c0_40, %c0_41] : memref<256x128xf32, #tpu.memory_space<vmem>>, vector<256x128xf32>
    tpu.vector_store %arg6[%c0_40, %c0_41], %45 {strides = array<i32>} : memref<256x128xf32, #tpu.memory_space<vmem>>, vector<256x128xf32>,
    %c0_42 = arith.constant 0 : index
    %c0_43 = arith.constant 0 : index
    %47 = vector.load %arg7[%c0_42, %c0_43] : memref<256x128xf32, #tpu.memory_space<vmem>>, vector<256x128xf32>
    tpu.vector_store %arg7[%c0_42, %c0_43], %41 {strides = array<i32>} : memref<256x128xf32, #tpu.memory_space<vmem>>, vector<256x128xf32>,
    return
  }
  func.func @transform_0(%arg0: i32) -> (i32, i32) {
    %c0_i32 = arith.constant 0 : i32
    %c0_i32_0 = arith.constant 0 : i32
    return %arg0, %c0_i32 : i32, i32
  }
  func.func @transform_1(%arg0: i32) -> (i32, i32) {
    %c0_i32 = arith.constant 0 : i32
    %c0_i32_0 = arith.constant 0 : i32
    %c0_i32_1 = arith.constant 0 : i32
    return %c0_i32, %c0_i32_0 : i32, i32
  }
  func.func @transform_2(%arg0: i32) -> (i32, i32) {
    %c0_i32 = arith.constant 0 : i32
    %c0_i32_0 = arith.constant 0 : i32
    %c0_i32_1 = arith.constant 0 : i32
    return %c0_i32, %c0_i32_0 : i32, i32
  }
  func.func @transform_3(%arg0: i32) -> (i32, i32) {
    %c0_i32 = arith.constant 0 : i32
    %c0_i32_0 = arith.constant 0 : i32
    %c0_i32_1 = arith.constant 0 : i32
    return %c0_i32, %c0_i32_0 : i32, i32
  }
  func.func @transform_4(%arg0: i32) -> (i32, i32) {
    %c0_i32 = arith.constant 0 : i32
    %c0_i32_0 = arith.constant 0 : i32
    %c0_i32_1 = arith.constant 0 : i32
    return %c0_i32, %c0_i32_0 : i32, i32
  }
  func.func @transform_5(%arg0: i32) -> (i32, i32) {
    %c0_i32 = arith.constant 0 : i32
    %c0_i32_0 = arith.constant 0 : i32
    return %arg0, %c0_i32 : i32, i32
  }
  func.func @transform_6(%arg0: i32) -> (i32, i32) {
    %c0_i32 = arith.constant 0 : i32
    %c0_i32_0 = arith.constant 0 : i32
    return %arg0, %c0_i32 : i32, i32
  }
}

</mosaic_0001>

<bundles_post_ra>
// kernel: run.1
= control target key start
LH: loop header
LB: loop body
LE: loop exit
PB: predicated region body
PF: predicated region fallthrough
CT: control target
= control target key end

     0   :  { %vm478_vm0 = vcmask 261120   ;;  %vm1762_vm2 = vcmask 1045504   ;;  %s4351_s1 = inlined_call_operand.vmem [shape: bf16[288,128], index: 1, kind: input, shape index: {}]   ;;  %s4352_s0 = inlined_call_operand.vmem [shape: bf16[256,288], index: 0, kind: input, shape index: {}]   ;;  %s4353_s3 = inlined_call_operand.vmem [shape: bf16[128,128], index: 3, kind: input, shape index: {}]   ;;  %s4354_s2 = inlined_call_operand.vmem [shape: f32[1,128], index: 2, kind: input, shape index: {}]   ;;  %s4355_s4 = inlined_call_operand.vmem [shape: f32[1,128], index: 4, kind: input, shape index: {}]   ;;  %s4356_s5 = inlined_call_operand.vmem [shape: f32[256,128], index: 5, kind: output, shape index: {0}]   ;;  %s4357_s6 = inlined_call_operand.vmem [shape: f32[256,128], index: 6, kind: output, shape index: {1}]  }
   0x1   :  { %v2811_v0 = vld [vmem:[%s4351_s1 + $0x40] sm:$0xff]   ;;  %v2813_v2 = vld [vmem:[%s4351_s1 + $0x48] sm:$0xff]   ;;  %v2815_v4 = vld [vmem:[%s4351_s1 + $0x50] sm:$0xff]  }
   0x2   :  { %v2812_v1 = vld [vmem:[%s4351_s1] sm:$0xff]   ;;  %2571 = vmatprep.subr.bf16.mxu0 %v2811_v0  ;;  %v2814_v3 = vld [vmem:[%s4351_s1 + $0x8] sm:$0xff]   ;;  %v2816_v5 = vld [vmem:[%s4351_s1 + $0x10] sm:$0xff]  }
   0x3   :  { %2572 = vmatpush3.bf16.msra.mxu0 %v2812_v1  ;;  %v2817_v6 = vld [vmem:[%s4351_s1 + $0x58] sm:$0xff]   ;;  %v2819_v8 = vld [vmem:[%s4351_s1 + $0x60] sm:$0xff]   ;;  %v2821_v11 = vld [vmem:[%s4351_s1 + $0x68] sm:$0xff]  }
   0x4   :  { %2573 = vmatprep.subr.bf16.mxu0 %v2813_v2  ;;  %v2818_v7 = vld [vmem:[%s4351_s1 + $0x18] sm:$0xff]   ;;  %v2820_v9 = vld [vmem:[%s4351_s1 + $0x20] sm:$0xff]   ;;  %v2822_v12 = vld [vmem:[%s4351_s1 + $0x28] sm:$0xff]  }
   0x5   :  { %v2826_v10 = vld [vmem:[%s4351_s1 + $0x80] sm:$0xff]   ;;  %v2823_v13 = vld [vmem:[%s4351_s1 + $0x70] sm:$0xff]   ;;  %v2831_v15 = vld [vmem:[%s4351_s1 + $0x88] sm:$0xff]  }
   0x6   :  { %2725 = vmatprep.subr.bf16.mxu1 %v2826_v10  ;;  %v2830_v14 = vld [vmem:[%s4352_s0 + $0x4] ss:$12 sps:$4 sm:$0xff]   ;;  %v2832_v16 = vld [vmem:[%s4352_s0 + $0x8] ss:$12 sps:$4 sm:$0xff]   ;;  %v2833_v17 = vld [vmem:[%s4352_s0 + $0x20] ss:$12 sps:$4 sm:$0xff]  }
   0x7   :  { %2574 = vmatpush3.bf16.msra.mxu0 %v2814_v3  ;;  %2726 = vmatpush3.bf16.msra.mxu1 %v2826_v10  ;;  %v2824_v18 = vld [vmem:[%s4351_s1 + $0x30] sm:$0xff]   ;;  %v2825_v19 = vld [vmem:[%s4351_s1 + $0x78] sm:$0xff]   ;;  %v2828_v22 = vld [vmem:[%s4352_s0] ss:$12 sps:$4 sm:$0xff]  }
   0x8   :  { %2575 = vmatprep.subr.bf16.mxu0 %v2815_v4  ;;  %559 = vmatprep.mubr.bf16.mxu0 %v2830_v14  ;;  %v2840_v20 = vld [vmem:[%s4352_s0 + $0x38] ss:$12 sps:$4 sm:$0xff]   ;;  %v2841_v23 = vld [vmem:[%s4352_s0 + $0x50] ss:$12 sps:$4 sm:$0xff]   ;;  %v2848_v24 = vld [vmem:[%s4352_s0 + $0x68] ss:$12 sps:$4 sm:$0xff]  }
   0x9   :  { %2727 = vmatprep.subr.bf16.mxu1 %v2831_v15  ;;  %2729 = vmatprep.mubr.msk.bf16.mxu1 %vm478_vm0, %v2832_v16  ;;  %v2827_v21 = vld [vmem:[%s4351_s1 + $0x38] sm:$0xff]   ;;  %v2849_v27 = vld [vmem:[%s4352_s0 + $0x80] ss:$12 sps:$4 sm:$0xff]   ;;  %v2864_v32 = vld [vmem:[%s4352_s0 + $0xc8] ss:$12 sps:$4 sm:$0xff]  }
   0xa   :  { %v2834_v25 = vld [vmem:[%s4352_s0 + $0x1c] ss:$12 sps:$4 sm:$0xff]   ;;  %v2836_v26 = vld [vmem:[%s4352_s0 + $0x18] ss:$12 sps:$4 sm:$0xff]   ;;  %v2837_v29 = vld [vmem:[%s4352_s0 + $0x34] ss:$12 sps:$4 sm:$0xff]  }
   0xb   :  { %2576 = vmatpush3.bf16.msra.mxu0 %v2816_v5  ;;  %2728 = vmatpush3.bf16.msra.mxu1 %v2831_v15  ;;  %v2856_v28 = vld [vmem:[%s4352_s0 + $0x98] ss:$12 sps:$4 sm:$0xff]   ;;  %v2839_v30 = vld [vmem:[%s4352_s0 + $0x30] ss:$12 sps:$4 sm:$0xff]   ;;  %v2844_v34 = vld [vmem:[%s4352_s0 + $0x48] ss:$12 sps:$4 sm:$0xff]  }
   0xc   :  { %2577 = vmatprep.subr.bf16.mxu0 %v2817_v6  ;;  %v2857_v31 = vld [vmem:[%s4352_s0 + $0xb0] ss:$12 sps:$4 sm:$0xff]   ;;  %v2842_v33 = vld [vmem:[%s4352_s0 + $0x4c] ss:$12 sps:$4 sm:$0xff]   ;;  %v2893_v38 = vld [vmem:[%s4353_s3] sm:$0xff]  }
   0xd   :  { %v2865_v35 = vld [vmem:[%s4352_s0 + $0xe0] ss:$12 sps:$4 sm:$0xff]   ;;  %v2872_v36 = vld [vmem:[%s4352_s0 + $0xf8] ss:$12 sps:$4 sm:$0xff]   ;;  %v2873_v40 = vld [vmem:[%s4352_s0 + $0x110] ss:$12 sps:$4 sm:$0xff]   ;;  %2761 = vmatprep.subr.bf16.mxu1 %v2893_v38 }
   0xe   :  { %2730 = vmatmul.mubr.msk.bf16.vlgmr.msra.gmra.mrb[0].mxu1 %vm478_vm0, %v2833_v17  ;;  %v2845_v37 = vld [vmem:[%s4352_s0 + $0x64] ss:$12 sps:$4 sm:$0xff]   ;;  %v2894_v39 = vld [vmem:[%s4353_s3 + $0x8] sm:$0xff]   ;;  %v2853_v48 = vld [vmem:[%s4352_s0 + $0x94] ss:$12 sps:$4 sm:$0xff]  }
   0xf   :  { %2578 = vmatpush3.bf16.msra.mxu0 %v2818_v7  ;;  %2733 = vmatprep.mubr.msk.bf16.mxu1 %vm478_vm0, %v2840_v20  ;;  %v2895_v41 = vld [vmem:[%s4353_s3 + $0x10] sm:$0xff]   ;;  %v2847_v42 = vld [vmem:[%s4352_s0 + $0x60] ss:$12 sps:$4 sm:$0xff]   ;;  %v2850_v44 = vld [vmem:[%s4352_s0 + $0x7c] ss:$12 sps:$4 sm:$0xff]  }
  0x10   :  { %2579 = vmatprep.subr.bf16.mxu0 %v2819_v8  ;;  %2762 = vmatpush3.bf16.msra.mxu1 %v2893_v38  ;;  %v2880_v43 = vld [vmem:[%s4352_s0 + $0x128] ss:$12 sps:$4 sm:$0xff]   ;;  %v2881_v45 = vld [vmem:[%s4352_s0 + $0x140] ss:$12 sps:$4 sm:$0xff]   ;;  %v2852_v46 = vld [vmem:[%s4352_s0 + $0x78] ss:$12 sps:$4 sm:$0xff]  }
  0x11   :  { %2763 = vmatprep.subr.bf16.mxu1 %v2894_v39  ;;  %v2888_v47 = vld [vmem:[%s4352_s0 + $0x158] ss:$12 sps:$4 sm:$0xff]   ;;  %v2889_v49 = vld [vmem:[%s4352_s0 + $0x170] ss:$12 sps:$4 sm:$0xff]   ;;  %v2860_v52 = vld [vmem:[%s4352_s0 + $0xa8] ss:$12 sps:$4 sm:$0xff]  }
  0x12   :  { %v2855_v50 = vld [vmem:[%s4352_s0 + $0x90] ss:$12 sps:$4 sm:$0xff]   ;;  %v2858_v51 = vld [vmem:[%s4352_s0 + $0xac] ss:$12 sps:$4 sm:$0xff]   ;;  %v2869_v57 = vld [vmem:[%s4352_s0 + $0xf4] ss:$12 sps:$4 sm:$0xff]  }
  0x13   :  { %2580 = vmatpush3.bf16.msra.mxu0 %v2820_v9  ;;  %v2861_v53 = vld [vmem:[%s4352_s0 + $0xc4] ss:$12 sps:$4 sm:$0xff]   ;;  %v2863_v54 = vld [vmem:[%s4352_s0 + $0xc0] ss:$12 sps:$4 sm:$0xff]   ;;  %v2866_v55 = vld [vmem:[%s4352_s0 + $0xdc] ss:$12 sps:$4 sm:$0xff]  }
  0x14   :  { %2581 = vmatprep.subr.bf16.mxu0 %v2821_v11  ;;  %2764 = vmatpush3.bf16.msra.mxu1 %v2894_v39  ;;  %v2868_v56 = vld [vmem:[%s4352_s0 + $0xd8] ss:$12 sps:$4 sm:$0xff]   ;;  %v2871_v58 = vld [vmem:[%s4352_s0 + $0xf0] ss:$12 sps:$4 sm:$0xff]   ;;  %v2876_v61 = vld [vmem:[%s4352_s0 + $0x108] ss:$12 sps:$4 sm:$0xff]  }
  0x15   :  { %2765 = vmatprep.subr.bf16.mxu1 %v2895_v41  ;;  %v2874_v59 = vld [vmem:[%s4352_s0 + $0x10c] ss:$12 sps:$4 sm:$0xff]   ;;  %v2877_v62 = vld [vmem:[%s4352_s0 + $0x124] ss:$12 sps:$4 sm:$0xff]   ;;  %v2882_v2 = vld [vmem:[%s4352_s0 + $0x13c] ss:$12 sps:$4 sm:$0xff]  }
  0x16   :  { %2734 = vmatmul.mubr.msk.bf16.gmra.mrb[4].mxu1 %vm478_vm0, %v2841_v23  ;;  %v2896_v60 = vld [vmem:[%s4353_s3 + $0x18] sm:$0xff]   ;;  %v2897_v63 = vld [vmem:[%s4353_s3 + $0x20] sm:$0xff]   ;;  %v2898_v0 = vld [vmem:[%s4353_s3 + $0x28] sm:$0xff]  }
  0x17   :  { %2582 = vmatpush3.bf16.msra.mxu0 %v2822_v12  ;;  %2737 = vmatprep.mubr.msk.bf16.mxu1 %vm478_vm0, %v2848_v24  ;;  %v2879_v1 = vld [vmem:[%s4352_s0 + $0x120] ss:$12 sps:$4 sm:$0xff]   ;;  %v2899_v3 = vld [vmem:[%s4353_s3 + $0x30] sm:$0xff]   ;;  %v2900_v4 = vld [vmem:[%s4353_s3 + $0x38] sm:$0xff]  }
  0x18   :  { %2583 = vmatprep.subr.bf16.mxu0 %v2823_v13  ;;  %2766 = vmatpush3.bf16.msra.mxu1 %v2895_v41  ;;  %v2884_v5 = vld [vmem:[%s4352_s0 + $0x138] ss:$12 sps:$4 sm:$0xff]   ;;  %v2885_v6 = vld [vmem:[%s4352_s0 + $0x154] ss:$12 sps:$4 sm:$0xff]   ;;  %v2887_v7 = vld [vmem:[%s4352_s0 + $0x150] ss:$12 sps:$4 sm:$0xff]  }
  0x19   :  { %2767 = vmatprep.subr.bf16.mxu1 %v2896_v60  ;;  %v2890_v8 = vld [vmem:[%s4352_s0 + $0x16c] ss:$12 sps:$4 sm:$0xff]   ;;  %v2892_v9 = vld [vmem:[%s4352_s0 + $0x168] ss:$12 sps:$4 sm:$0xff]  }
  0x1b   :  { %2584 = vmatpush3.bf16.msra.mxu0 %v2824_v18  ;;  %v3311_v18 = vld [vmem:[%s4354_s2] ss:$0 sm:$0xff] }
  0x1c   :  { %2585 = vmatprep.subr.bf16.mxu0 %v2825_v19  ;;  %2768 = vmatpush3.bf16.msra.mxu1 %v2896_v60 }
  0x1d   :  { %2769 = vmatprep.subr.bf16.mxu1 %v2897_v63 }
  0x1e   :  { %2738 = vmatmul.mubr.msk.bf16.gmra.mrb[8].mxu1 %vm478_vm0, %v2849_v27 }
  0x1f   :  { %2586 = vmatpush3.bf16.msra.mxu0 %v2827_v21  ;;  %2741 = vmatprep.mubr.msk.bf16.mxu1 %vm478_vm0, %v2856_v28 }
  0x20   :  { %2770 = vmatpush3.bf16.msra.mxu1 %v2897_v63 }
  0x21   :  { %2771 = vmatprep.subr.bf16.mxu1 %v2898_v0 }
  0x22   :  { %560 = vmatmul.mubr.bf16.vlgmr.msra.gmra.mrb[0].mxu0 %v2828_v22 }
  0x23   :  { %567 = vmatprep.mubr.bf16.mxu0 %v2834_v25 }
  0x24   :  { %2772 = vmatpush3.bf16.msra.mxu1 %v2898_v0 }
  0x25   :  { %2773 = vmatprep.subr.bf16.mxu1 %v2899_v3 }
  0x26   :  { %2742 = vmatmul.mubr.msk.bf16.gmra.mrb[12].mxu1 %vm478_vm0, %v2857_v31 }
  0x27   :  { %2745 = vmatprep.mubr.msk.bf16.mxu1 %vm478_vm0, %v2864_v32 }
  0x28   :  { %2774 = vmatpush3.bf16.msra.mxu1 %v2899_v3 }
  0x29   :  { %2775 = vmatprep.subr.bf16.mxu1 %v2900_v4 }
  0x2a   :  { %568 = vmatmul.mubr.bf16.gmra.mrb[4].mxu0 %v2836_v26 }
  0x2b   :  { %575 = vmatprep.mubr.bf16.mxu0 %v2837_v29 }
  0x2c   :  { %2776 = vmatpush3.bf16.msra.mxu1 %v2900_v4 }
  0x2e   :  { %2746 = vmatmul.mubr.msk.bf16.gmra.mrb[16].mxu1 %vm478_vm0, %v2865_v35 }
  0x2f   :  { %2749 = vmatprep.mubr.msk.bf16.mxu1 %vm478_vm0, %v2872_v36 }
  0x32   :  { %576 = vmatmul.mubr.bf16.gmra.mrb[8].mxu0 %v2839_v30 }
  0x33   :  { %583 = vmatprep.mubr.bf16.mxu0 %v2842_v33 }
  0x36   :  { %2750 = vmatmul.mubr.msk.bf16.gmra.mrb[20].mxu1 %vm478_vm0, %v2873_v40 }
  0x37   :  { %2753 = vmatprep.mubr.msk.bf16.mxu1 %vm478_vm0, %v2880_v43 }
  0x3a   :  { %584 = vmatmul.mubr.bf16.gmra.mrb[12].mxu0 %v2844_v34 }
  0x3b   :  { %591 = vmatprep.mubr.bf16.mxu0 %v2845_v37 }
  0x3e   :  { %2754 = vmatmul.mubr.msk.bf16.gmra.mrb[24].mxu1 %vm478_vm0, %v2881_v45 }
  0x3f   :  { %2757 = vmatprep.mubr.msk.bf16.mxu1 %vm478_vm0, %v2888_v47 }
  0x42   :  { %592 = vmatmul.mubr.bf16.gmra.mrb[16].mxu0 %v2847_v42 }
  0x43   :  { %599 = vmatprep.mubr.bf16.mxu0 %v2850_v44 }
  0x46   :  { %2758 = vmatmul.mubr.msk.bf16.gmra.mrb[28].mxu1 %vm478_vm0, %v2889_v49 }
  0x4a   :  { %600 = vmatmul.mubr.bf16.gmra.mrb[20].mxu0 %v2852_v46 }
  0x4b   :  { %607 = vmatprep.mubr.bf16.mxu0 %v2853_v48 }
  0x52   :  { %608 = vmatmul.mubr.bf16.gmra.mrb[24].mxu0 %v2855_v50 }
  0x53   :  { %615 = vmatprep.mubr.bf16.mxu0 %v2858_v51 }
  0x5a   :  { %616 = vmatmul.mubr.bf16.gmra.mrb[28].mxu0 %v2860_v52 }
  0x5b   :  { %623 = vmatprep.mubr.bf16.mxu0 %v2861_v53 }
  0x62   :  { %624 = vmatmul.mubr.bf16.gmra.mrb[32].mxu0 %v2863_v54 }
  0x63   :  { %631 = vmatprep.mubr.bf16.mxu0 %v2866_v55 }
  0x6a   :  { %632 = vmatmul.mubr.bf16.gmra.mrb[36].mxu0 %v2868_v56 }
  0x6b   :  { %639 = vmatprep.mubr.bf16.mxu0 %v2869_v57 }
  0x72   :  { %640 = vmatmul.mubr.bf16.gmra.mrb[40].mxu0 %v2871_v58 }
  0x73   :  { %647 = vmatprep.mubr.bf16.mxu0 %v2874_v59 }
  0x7a   :  { %648 = vmatmul.mubr.bf16.gmra.mrb[44].mxu0 %v2876_v61 }
  0x7b   :  { %655 = vmatprep.mubr.bf16.mxu0 %v2877_v62 }
  0x82   :  { %656 = vmatmul.mubr.bf16.gmra.mrb[48].mxu0 %v2879_v1 }
  0x83   :  { %663 = vmatprep.mubr.bf16.mxu0 %v2882_v2 }
  0x8a   :  { %664 = vmatmul.mubr.bf16.gmra.mrb[52].mxu0 %v2884_v5 }
  0x8b   :  { %671 = vmatprep.mubr.bf16.mxu0 %v2885_v6 }
  0x92   :  { %672 = vmatmul.mubr.bf16.gmra.mrb[56].mxu0 %v2887_v7 }
  0x93   :  { %679 = vmatprep.mubr.bf16.mxu0 %v2890_v8 }
  0x9a   :  { %680 = vmatmul.mubr.bf16.gmra.mrb[60].mxu0 %v2892_v9 }
  0xe1   :  { %v2731_v10 = vpop.f32.mrb[0].mxu1 }
  0xe2   :  { %v722_v11 = vpop.f32.mrb[1].mxu1 }
  0xe3   :  { %v2732_v12 = vpop.f32.mrb[2].mxu1 }
  0xe4   :  { %v725_v13 = vpop.f32.mrb[3].mxu1 }
  0xe9   :  { %v3306_v14 = vpop.f32.mrb[4].mxu1 }
  0xea   :  { %v738_v16 = vpop.f32.mrb[5].mxu1 }
  0xeb   :  { %v3313_v19 = vpop.f32.mrb[6].mxu1 }
  0xec   :  { %v741_v22 = vpop.f32.mrb[7].mxu1 }
  0xf1   :  { %v3317_v28 = vpop.f32.mrb[8].mxu1 }
  0xf2   :  { %v3319_v31 = vpop.f32.mrb[9].mxu1 }
  0xf3   :  { %v3321_v33 = vpop.f32.mrb[10].mxu1 }
  0xf4   :  { %v3323_v38 = vpop.f32.mrb[11].mxu1 }
  0xf5   :  { %v2587_v15 = vpop.f32.mrb[0].mxu0 }
  0xf6   :  { %v2588_v17 = vpop.f32.mrb[1].mxu0 }
  0xf7   :  { %v2589_v20 = vadd.f32 %v2588_v17, %v2587_v15  ;;  %v2590_v21 = vpop.f32.mrb[2].mxu0 }
  0xf8   :  { %v2591_v23 = vpop.f32.mrb[3].mxu0 }
  0xf9   :  { %v2592_v24 = vadd.f32 %v2591_v23, %v2590_v21  ;;  %v562_v25 = vadd.f32 %v2589_v20, %v3311_v18  ;;  %v3327_v45 = vpop.f32.mrb[12].mxu1 }
  0xfa   :  { %v3329_v48 = vpop.f32.mrb[13].mxu1 }
  0xfb   :  { %v723_v26 = vadd.f32 %v722_v11, %v562_v25  ;;  %v565_v27 = vadd.f32 %v2592_v24, %v3311_v18  ;;  %v3331_v50 = vpop.f32.mrb[14].mxu1 }
  0xfc   :  { %v3333_v55 = vpop.f32.mrb[15].mxu1 }
  0xfd   :  { %v726_v29 = vadd.f32 %v725_v13, %v565_v27  ;;  %v2593_v30 = vpop.f32.mrb[4].mxu0  ;;  %v849_v34 = vmax.f32 %v723_v26, 0.0 }
  0xfe   :  { %v2594_v32 = vpop.f32.mrb[5].mxu0 }
  0xff   :  { %v850_v35 = vmax.f32 %v726_v29, 0.0  ;;  %v2595_v36 = vadd.f32 %v2594_v32, %v2593_v30  ;;  %v2596_v37 = vpop.f32.mrb[6].mxu0 }
 0x100   :  { %v2597_v39 = vpop.f32.mrb[7].mxu0 }
 0x101   :  { %v881_v40 = vpack.c.bf16 %v850_v35, %v849_v34  ;;  %v570_v41 = vadd.f32 %v2595_v36, %v3311_v18  ;;  %v2598_v42 = vadd.f32 %v2597_v39, %v2596_v37  ;;  %v3337_v62 = vpop.f32.mrb[16].mxu1 }
 0x102   :  { %v3339_v1 = vpop.f32.mrb[17].mxu1 }
 0x103   :  { %v731_v43 = vadd.f32 %v2731_v10, %v570_v41  ;;  %v573_v44 = vadd.f32 %v2598_v42, %v3311_v18  ;;  %2777 = vmatprep.mubr.bf16.mxu1 %v881_v40  ;;  %v3341_v3 = vpop.f32.mrb[18].mxu1 }
 0x104   :  { %v3343_v8 = vpop.f32.mrb[19].mxu1 }
 0x105   :  { %v734_v46 = vadd.f32 %v2732_v12, %v573_v44  ;;  %v2599_v47 = vpop.f32.mrb[8].mxu0  ;;  %v851_v51 = vmax.f32 %v731_v43, 0.0 }
 0x106   :  { %v2600_v49 = vpop.f32.mrb[9].mxu0 }
 0x107   :  { %v852_v52 = vmax.f32 %v734_v46, 0.0  ;;  %v2601_v53 = vadd.f32 %v2600_v49, %v2599_v47  ;;  %v2602_v54 = vpop.f32.mrb[10].mxu0 }
 0x108   :  { %v2603_v56 = vpop.f32.mrb[11].mxu0 }
 0x109   :  { %v882_v57 = vpack.c.bf16 %v852_v52, %v851_v51  ;;  %v2604_v58 = vadd.f32 %v2603_v56, %v2602_v54  ;;  %v578_v59 = vadd.f32 %v2601_v53, %v3311_v18 }
 0x10b   :  { %v739_v60 = vadd.f32 %v738_v16, %v578_v59  ;;  %2778 = vmatmul.mubr.bf16.vlgmr.msra.gmra.mrb[32].mxu1 %v882_v57  ;;  %v581_v61 = vadd.f32 %v2604_v58, %v3311_v18  ;;  %v3348_v16 = vpop.f32.mrb[20].mxu1 }
 0x10c   :  { %v3351_v21 = vpop.f32.mrb[21].mxu1 }
 0x10d   :  { %v742_v63 = vadd.f32 %v741_v22, %v581_v61  ;;  %v2605_v0 = vpop.f32.mrb[12].mxu0  ;;  %v853_v4 = vmax.f32 %v739_v60, 0.0  ;;  %v3353_v23 = vpop.f32.mrb[22].mxu1 }
 0x10e   :  { %v2606_v2 = vpop.f32.mrb[13].mxu0  ;;  %v3355_v29 = vpop.f32.mrb[23].mxu1 }
 0x10f   :  { %v854_v5 = vmax.f32 %v742_v63, 0.0  ;;  %v2607_v6 = vadd.f32 %v2606_v2, %v2605_v0  ;;  %v2608_v7 = vpop.f32.mrb[14].mxu0 }
 0x110   :  { %v2609_v9 = vpop.f32.mrb[15].mxu0 }
 0x111   :  { %v883_v10 = vpack.c.bf16 %v854_v5, %v853_v4  ;;  %v586_v11 = vadd.f32 %v2607_v6, %v3311_v18  ;;  %v2610_v12 = vadd.f32 %v2609_v9, %v2608_v7  ;;  %v3360_v36 = vpop.f32.mrb[24].mxu1 }
 0x112   :  { %v3363_v40 = vpop.f32.mrb[25].mxu1 }
 0x113   :  { %v747_v13 = vadd.f32 %v3306_v14, %v586_v11  ;;  %v589_v15 = vadd.f32 %v2610_v12, %v3311_v18  ;;  %2781 = vmatprep.mubr.bf16.mxu1 %v883_v10  ;;  %v3365_v42 = vpop.f32.mrb[26].mxu1 }
 0x114   :  { %v3367_v49 = vpop.f32.mrb[27].mxu1 }
 0x115   :  { %v750_v17 = vadd.f32 %v3313_v19, %v589_v15  ;;  %v2611_v20 = vpop.f32.mrb[16].mxu0  ;;  %v855_v24 = vmax.f32 %v747_v13, 0.0 }
 0x116   :  { %v2612_v22 = vpop.f32.mrb[17].mxu0 }
 0x117   :  { %v856_v25 = vmax.f32 %v750_v17, 0.0  ;;  %v2613_v26 = vadd.f32 %v2612_v22, %v2611_v20  ;;  %v2614_v27 = vpop.f32.mrb[18].mxu0 }
 0x118   :  { %v2615_v14 = vpop.f32.mrb[19].mxu0 }
 0x119   :  { %v2616_v30 = vadd.f32 %v2615_v14, %v2614_v27  ;;  %v594_v32 = vadd.f32 %v2613_v26, %v3311_v18  ;;  %v884_v34 = vpack.c.bf16 %v856_v25, %v855_v24  ;;  %v3372_v56 = vpop.f32.mrb[28].mxu1 }
 0x11a   :  { %v3375_v59 = vpop.f32.mrb[29].mxu1 }
 0x11b   :  { %v755_v35 = vadd.f32 %v3319_v31, %v594_v32  ;;  %2782 = vmatmul.mubr.bf16.gmra.mrb[36].mxu1 %v884_v34  ;;  %v597_v19 = vadd.f32 %v2616_v30, %v3311_v18  ;;  %v3377_v61 = vpop.f32.mrb[30].mxu1 }
 0x11c   :  { %v3379_v5 = vpop.f32.mrb[31].mxu1 }
 0x11d   :  { %v758_v37 = vadd.f32 %v3323_v38, %v597_v19  ;;  %v2617_v39 = vpop.f32.mrb[20].mxu0  ;;  %v857_v43 = vmax.f32 %v755_v35, 0.0 }
 0x11e   :  { %v2618_v41 = vpop.f32.mrb[21].mxu0 }
 0x11f   :  { %v858_v44 = vmax.f32 %v758_v37, 0.0  ;;  %v2619_v46 = vadd.f32 %v2618_v41, %v2617_v39  ;;  %v2620_v47 = vpop.f32.mrb[22].mxu0 }
 0x120   :  { %v2621_v31 = vpop.f32.mrb[23].mxu0 }
 0x121   :  { %v885_v51 = vpack.c.bf16 %v858_v44, %v857_v43  ;;  %v602_v52 = vadd.f32 %v2619_v46, %v3311_v18  ;;  %v2622_v53 = vadd.f32 %v2621_v31, %v2620_v47 }
 0x123   :  { %v763_v54 = vadd.f32 %v3317_v28, %v602_v52  ;;  %v605_v38 = vadd.f32 %v2622_v53, %v3311_v18  ;;  %2785 = vmatprep.mubr.bf16.mxu1 %v885_v51 }
 0x125   :  { %v766_v57 = vadd.f32 %v3321_v33, %v605_v38  ;;  %v2623_v58 = vpop.f32.mrb[24].mxu0  ;;  %v859_v63 = vmax.f32 %v763_v54, 0.0 }
 0x126   :  { %v2624_v60 = vpop.f32.mrb[25].mxu0 }
 0x127   :  { %v860_v0 = vmax.f32 %v766_v57, 0.0  ;;  %v2625_v2 = vadd.f32 %v2624_v60, %v2623_v58  ;;  %v2626_v4 = vpop.f32.mrb[26].mxu0 }
 0x128   :  { %v2627_v28 = vpop.f32.mrb[27].mxu0 }
 0x129   :  { %v2628_v6 = vadd.f32 %v2627_v28, %v2626_v4  ;;  %v610_v7 = vadd.f32 %v2625_v2, %v3311_v18  ;;  %v886_v9 = vpack.c.bf16 %v860_v0, %v859_v63 }
 0x12b   :  { %v771_v10 = vadd.f32 %v3329_v48, %v610_v7  ;;  %2786 = vmatmul.mubr.bf16.gmra.mrb[40].mxu1 %v886_v9  ;;  %v613_v33 = vadd.f32 %v2628_v6, %v3311_v18 }
 0x12d   :  { %v774_v11 = vadd.f32 %v3333_v55, %v613_v33  ;;  %v2629_v12 = vpop.f32.mrb[28].mxu0  ;;  %v861_v15 = vmax.f32 %v771_v10, 0.0 }
 0x12e   :  { %v2630_v13 = vpop.f32.mrb[29].mxu0 }
 0x12f   :  { %v862_v17 = vmax.f32 %v774_v11, 0.0  ;;  %v2631_v20 = vadd.f32 %v2630_v13, %v2629_v12  ;;  %v2632_v22 = vpop.f32.mrb[30].mxu0 }
 0x130   :  { %v2633_v24 = vpop.f32.mrb[31].mxu0 }
 0x131   :  { %v887_v25 = vpack.c.bf16 %v862_v17, %v861_v15  ;;  %v618_v26 = vadd.f32 %v2631_v20, %v3311_v18  ;;  %v2634_v27 = vadd.f32 %v2633_v24, %v2632_v22 }
 0x133   :  { %v779_v14 = vadd.f32 %v3327_v45, %v618_v26  ;;  %v621_v48 = vadd.f32 %v2634_v27, %v3311_v18  ;;  %2789 = vmatprep.mubr.bf16.mxu1 %v887_v25 }
 0x135   :  { %v782_v30 = vadd.f32 %v3331_v50, %v621_v48  ;;  %v2635_v32 = vpop.f32.mrb[32].mxu0  ;;  %v863_v34 = vmax.f32 %v779_v14, 0.0 }
 0x136   :  { %v2636_v55 = vpop.f32.mrb[33].mxu0 }
 0x137   :  { %v864_v35 = vmax.f32 %v782_v30, 0.0  ;;  %v2637_v19 = vadd.f32 %v2636_v55, %v2635_v32  ;;  %v2638_v37 = vpop.f32.mrb[34].mxu0 }
 0x138   :  { %v2639_v39 = vpop.f32.mrb[35].mxu0 }
 0x139   :  { %v2640_v41 = vadd.f32 %v2639_v39, %v2638_v37  ;;  %v626_v43 = vadd.f32 %v2637_v19, %v3311_v18  ;;  %v888_v44 = vpack.c.bf16 %v864_v35, %v863_v34 }
 0x13b   :  { %v787_v46 = vadd.f32 %v3339_v1, %v626_v43  ;;  %2790 = vmatmul.mubr.bf16.gmra.mrb[44].mxu1 %v888_v44  ;;  %v629_v45 = vadd.f32 %v2640_v41, %v3311_v18 }
 0x13d   :  { %v790_v47 = vadd.f32 %v3343_v8, %v629_v45  ;;  %v2641_v31 = vpop.f32.mrb[36].mxu0  ;;  %v865_v51 = vmax.f32 %v787_v46, 0.0 }
 0x13e   :  { %v2642_v50 = vpop.f32.mrb[37].mxu0 }
 0x13f   :  { %v866_v52 = vmax.f32 %v790_v47, 0.0  ;;  %v2643_v53 = vadd.f32 %v2642_v50, %v2641_v31  ;;  %v2644_v54 = vpop.f32.mrb[38].mxu0 }
 0x140   :  { %v2645_v38 = vpop.f32.mrb[39].mxu0 }
 0x141   :  { %v889_v57 = vpack.c.bf16 %v866_v52, %v865_v51  ;;  %v634_v58 = vadd.f32 %v2643_v53, %v3311_v18  ;;  %v2646_v60 = vadd.f32 %v2645_v38, %v2644_v54 }
 0x143   :  { %v795_v63 = vadd.f32 %v3337_v62, %v634_v58  ;;  %v637_v1 = vadd.f32 %v2646_v60, %v3311_v18  ;;  %2793 = vmatprep.mubr.bf16.mxu1 %v889_v57 }
 0x145   :  { %v798_v0 = vadd.f32 %v3341_v3, %v637_v1  ;;  %v2647_v2 = vpop.f32.mrb[40].mxu0  ;;  %v867_v4 = vmax.f32 %v795_v63, 0.0 }
 0x146   :  { %v2648_v8 = vpop.f32.mrb[41].mxu0 }
 0x147   :  { %v868_v28 = vmax.f32 %v798_v0, 0.0  ;;  %v2649_v6 = vadd.f32 %v2648_v8, %v2647_v2  ;;  %v2650_v7 = vpop.f32.mrb[42].mxu0 }
 0x148   :  { %v2651_v9 = vpop.f32.mrb[43].mxu0 }
 0x149   :  { %v2652_v10 = vadd.f32 %v2651_v9, %v2650_v7  ;;  %v642_v33 = vadd.f32 %v2649_v6, %v3311_v18  ;;  %v890_v11 = vpack.c.bf16 %v868_v28, %v867_v4 }
 0x14b   :  { %v803_v12 = vadd.f32 %v3351_v21, %v642_v33  ;;  %2794 = vmatmul.mubr.bf16.gmra.mrb[48].mxu1 %v890_v11  ;;  %v645_v62 = vadd.f32 %v2652_v10, %v3311_v18 }
 0x14d   :  { %v806_v13 = vadd.f32 %v3355_v29, %v645_v62  ;;  %v2653_v15 = vpop.f32.mrb[44].mxu0  ;;  %v869_v17 = vmax.f32 %v803_v12, 0.0 }
 0x14e   :  { %v2654_v3 = vpop.f32.mrb[45].mxu0 }
 0x14f   :  { %v870_v20 = vmax.f32 %v806_v13, 0.0  ;;  %v2655_v22 = vadd.f32 %v2654_v3, %v2653_v15  ;;  %v2656_v24 = vpop.f32.mrb[46].mxu0 }
 0x150   :  { %v2657_v25 = vpop.f32.mrb[47].mxu0 }
 0x151   :  { %v891_v26 = vpack.c.bf16 %v870_v20, %v869_v17  ;;  %v650_v27 = vadd.f32 %v2655_v22, %v3311_v18  ;;  %v2658_v14 = vadd.f32 %v2657_v25, %v2656_v24  ;;  %v3031_v22 = vmov -1.0  }
 0x152   :  { %1330 = vst [vmem:[#allocation2 + $0x48] sm:$0xff] %v3031_v22 }
 0x153   :  { %v811_v48 = vadd.f32 %v3348_v16, %v650_v27  ;;  %v653_v21 = vadd.f32 %v2658_v14, %v3311_v18  ;;  %2797 = vmatprep.mubr.bf16.mxu1 %v891_v26  ;;  %v3425_v27 = vld [vmem:[%s4355_s4] ss:$0 sm:$0xff] }
 0x155   :  { %v814_v30 = vadd.f32 %v3353_v23, %v653_v21  ;;  %v2659_v32 = vpop.f32.mrb[48].mxu0  ;;  %v871_v55 = vmax.f32 %v811_v48, 0.0 }
 0x156   :  { %v2660_v29 = vpop.f32.mrb[49].mxu0 }
 0x157   :  { %v872_v34 = vmax.f32 %v814_v30, 0.0  ;;  %v2661_v35 = vadd.f32 %v2660_v29, %v2659_v32  ;;  %v2662_v19 = vpop.f32.mrb[50].mxu0 }
 0x158   :  { %v2663_v37 = vpop.f32.mrb[51].mxu0 }
 0x159   :  { %v2664_v39 = vadd.f32 %v2663_v37, %v2662_v19  ;;  %v658_v41 = vadd.f32 %v2661_v35, %v3311_v18  ;;  %v892_v43 = vpack.c.bf16 %v872_v34, %v871_v55 }
 0x15b   :  { %v819_v44 = vadd.f32 %v3363_v40, %v658_v41  ;;  %2798 = vmatmul.mubr.bf16.gmra.mrb[52].mxu1 %v892_v43  ;;  %v661_v16 = vadd.f32 %v2664_v39, %v3311_v18 }
 0x15d   :  { %v822_v46 = vadd.f32 %v3367_v49, %v661_v16  ;;  %v2665_v45 = vpop.f32.mrb[52].mxu0  ;;  %v873_v47 = vmax.f32 %v819_v44, 0.0 }
 0x15e   :  { %v2666_v23 = vpop.f32.mrb[53].mxu0 }
 0x15f   :  { %v874_v31 = vmax.f32 %v822_v46, 0.0  ;;  %v2667_v50 = vadd.f32 %v2666_v23, %v2665_v45  ;;  %v2668_v51 = vpop.f32.mrb[54].mxu0 }
 0x160   :  { %v2669_v52 = vpop.f32.mrb[55].mxu0 }
 0x161   :  { %v893_v53 = vpack.c.bf16 %v874_v31, %v873_v47  ;;  %v666_v54 = vadd.f32 %v2667_v50, %v3311_v18  ;;  %v2670_v38 = vadd.f32 %v2669_v52, %v2668_v51  ;;  %v2340_v51 = vlaneseq }
 0x163   :  { %v827_v57 = vadd.f32 %v3360_v36, %v666_v54  ;;  %v669_v40 = vadd.f32 %v2670_v38, %v3311_v18  ;;  %2801 = vmatprep.mubr.bf16.mxu1 %v893_v53 }
 0x165   :  { %v830_v58 = vadd.f32 %v3365_v42, %v669_v40  ;;  %v2671_v60 = vpop.f32.mrb[56].mxu0  ;;  %v875_v63 = vmax.f32 %v827_v57, 0.0 }
 0x166   :  { %v2672_v49 = vpop.f32.mrb[57].mxu0 }
 0x167   :  { %v876_v1 = vmax.f32 %v830_v58, 0.0  ;;  %v2673_v0 = vadd.f32 %v2672_v49, %v2671_v60  ;;  %v2674_v2 = vpop.f32.mrb[58].mxu0 }
 0x168   :  { %v2675_v8 = vpop.f32.mrb[59].mxu0 }
 0x169   :  { %v2676_v4 = vadd.f32 %v2675_v8, %v2674_v2  ;;  %v674_v28 = vadd.f32 %v2673_v0, %v3311_v18  ;;  %v894_v6 = vpack.c.bf16 %v876_v1, %v875_v63 }
 0x16b   :  { %v835_v7 = vadd.f32 %v3375_v59, %v674_v28  ;;  %2802 = vmatmul.mubr.bf16.gmra.mrb[56].mxu1 %v894_v6  ;;  %v677_v36 = vadd.f32 %v2676_v4, %v3311_v18  ;;  %v3459_v4 = vand.u32 127, %v2340_v51  ;;  %v3463_v6 = vrot.slane %v3031_v22, 2 }
 0x16d   :  { %v838_v9 = vadd.f32 %v3379_v5, %v677_v36  ;;  %v2677_v10 = vpop.f32.mrb[60].mxu0  ;;  %v877_v33 = vmax.f32 %v835_v7, 0.0  ;;  %vm2342_vm1 = vcmp.lt.s32.totalorder %v3459_v4, 4 }
 0x16e   :  { %v2678_v42 = vpop.f32.mrb[61].mxu0 }
 0x16f   :  { %v878_v11 = vmax.f32 %v838_v9, 0.0  ;;  %v2679_v12 = vadd.f32 %v2678_v42, %v2677_v10  ;;  %v2680_v62 = vpop.f32.mrb[62].mxu0 }
 0x170   :  { %v2681_v13 = vpop.f32.mrb[63].mxu0 }
 0x171   :  { %v895_v15 = vpack.c.bf16 %v878_v11, %v877_v33  ;;  %v682_v3 = vadd.f32 %v2679_v12, %v3311_v18  ;;  %v2682_v17 = vadd.f32 %v2681_v13, %v2680_v62 }
 0x173   :  { %v843_v20 = vadd.f32 %v3372_v56, %v682_v3  ;;  %v685_v59 = vadd.f32 %v2682_v17, %v3311_v18  ;;  %2805 = vmatprep.mubr.bf16.mxu1 %v895_v15 }
 0x175   :  { %v846_v5 = vadd.f32 %v3377_v61, %v685_v59  ;;  %v879_v24 = vmax.f32 %v843_v20, 0.0 }
 0x177   :  { %v880_v25 = vmax.f32 %v846_v5, 0.0 }
 0x179   :  { %v896_v26 = vpack.c.bf16 %v880_v25, %v879_v24 }
 0x17b   :  { %2806 = vmatmul.mubr.bf16.gmra.mrb[60].mxu1 %v896_v26 }
 0x1de   :  { %v2779_v14 = vpop.f32.mrb[32].mxu1 }
 0x1df   :  { %v3428_v56 = vadd.f32 %v2779_v14, %v3425_v27  ;;  %v1002_v18 = vpop.f32.mrb[33].mxu1 }
 0x1e0   :  { %v3431_v48 = vadd.f32 %v3425_v27, %v1002_v18  ;;  %v2780_v21 = vpop.f32.mrb[34].mxu1 }
 0x1e1   :  { %v1131_v61 = vsub.f32 0.0, %v3428_v56  ;;  %v3435_v30 = vadd.f32 %v2780_v21, %v3425_v27  ;;  %v1005_v32 = vpop.f32.mrb[35].mxu1 }
 0x1e2   :  { %v1129_v29 = vsub.f32 0.0, %v3431_v48  ;;  %v3439_v55 = vadd.f32 %v3425_v27, %v1005_v32 }
 0x1e3   :  { %v1165_v34 = vmul.f32 1.442695, %v1131_v61  ;;  %v1132_v35 = vsub.f32 0.0, %v3435_v30 }
 0x1e4   :  { %v1161_v19 = vmul.f32 1.442695, %v1129_v29  ;;  %v1130_v37 = vsub.f32 0.0, %v3439_v55 }
 0x1e5   :  { %2901 = vpow2.f32 %v1165_v34  ;;  %v1167_v39 = vmul.f32 1.442695, %v1132_v35 }
 0x1e6   :  { %2903 = vpow2.f32 %v1161_v19  ;;  %v1163_v41 = vmul.f32 1.442695, %v1130_v37 }
 0x1e7   :  { %2905 = vpow2.f32 %v1167_v39 }
 0x1e8   :  { %2907 = vpow2.f32 %v1163_v41 }
 0x1ee   :  { %v2783_v43 = vpop.f32.mrb[36].mxu1 }
 0x1ef   :  { %v2902_v44 = vpop.eup %2901  ;;  %v3444_v16 = vadd.f32 %v2783_v43, %v3425_v27  ;;  %v1018_v46 = vpop.f32.mrb[37].mxu1 }
 0x1f0   :  { %v2904_v45 = vpop.eup %2903  ;;  %v1227_v23 = vadd.f32 1.0, %v2902_v44  ;;  %v3447_v47 = vadd.f32 %v3425_v27, %v1018_v46  ;;  %v2784_v31 = vpop.f32.mrb[38].mxu1 }
 0x1f1   :  { %v2906_v50 = vpop.eup %2905  ;;  %v1225_v52 = vadd.f32 1.0, %v2904_v45  ;;  %v1135_v53 = vsub.f32 0.0, %v3444_v16  ;;  %v3451_v54 = vadd.f32 %v2784_v31, %v3425_v27  ;;  %v1021_v38 = vpop.f32.mrb[39].mxu1 }
 0x1f2   :  { %v2908_v57 = vpop.eup %2907  ;;  %2909 = vrcp.f32 %v1227_v23  ;;  %v1228_v40 = vadd.f32 1.0, %v2906_v50  ;;  %v1133_v58 = vsub.f32 0.0, %v3447_v47  ;;  %v3455_v60 = vadd.f32 %v3425_v27, %v1021_v38 }
 0x1f3   :  { %2911 = vrcp.f32 %v1225_v52  ;;  %v1226_v49 = vadd.f32 1.0, %v2908_v57  ;;  %v1173_v63 = vmul.f32 1.442695, %v1135_v53  ;;  %v1136_v1 = vsub.f32 0.0, %v3451_v54 }
 0x1f4   :  { %2913 = vrcp.f32 %v1228_v40  ;;  %v1169_v0 = vmul.f32 1.442695, %v1133_v58  ;;  %v1134_v2 = vsub.f32 0.0, %v3455_v60 }
 0x1f5   :  { %2915 = vrcp.f32 %v1226_v49  ;;  %v1175_v8 = vmul.f32 1.442695, %v1136_v1 }
 0x1f6   :  { %2917 = vpow2.f32 %v1173_v63  ;;  %v1171_v28 = vmul.f32 1.442695, %v1134_v2 }
 0x1f7   :  { %2919 = vpow2.f32 %v1169_v0 }
 0x1f8   :  { %2921 = vpow2.f32 %v1175_v8 }
 0x1f9   :  { %2923 = vpow2.f32 %v1171_v28 }
 0x1fc   :  { %v3465_v7 = vpop.eup %2909 }
 0x1fd   :  { %v3467_v36 = vpop.eup %2911  ;;  %1444 = vst [vmem:[#allocation2 + $0x50] sm:$0xff] %v3465_v7  ;;  %v1604_v9 = vrot.slane %v3465_v7, 1  ;;  %v1769_v10 = vrot.slane %v3465_v7, 2  ;;  %v2345_v42 = vsel %vm2342_vm1, %v3465_v7, %v3428_v56 }
 0x1fe   :  { %v3476_v33 = vpop.eup %2913  ;;  %2377 = vst [vmem:[%s4356_s5 + $0x10] sm:$0xff] %v2345_v42  ;;  %1442 = vst [vmem:[#allocation2 + $0x20] sm:$0xff] %v3467_v36  ;;  %v1602_v11 = vrot.slane %v3467_v36, 1  ;;  %v1763_v12 = vrot.slane %v3467_v36, 2  ;;  %v2343_v62 = vsel %vm2342_vm1, %v3467_v36, %v3431_v48  ;;  %v2787_v13 = vpop.f32.mrb[40].mxu1 }
 0x1ff   :  { %v3488_v15 = vpop.eup %2915  ;;  %v1670_v3 = vmax.f32 %v1604_v9, -1.0  ;;  %v1671_v17 = vmax.f32 %v3465_v7, %v1604_v9  ;;  %v1771_v20 = vsel %vm1762_vm2, %v1769_v10, %v3463_v6  ;;  %2375 = vst [vmem:[%s4356_s5] sm:$0xff] %v2343_v62  ;;  %1445 = vst [vmem:[#allocation2 + $0x68] sm:$0xff] %v3476_v33  ;;  %v1605_v59 = vrot.slane %v3476_v33, 1  ;;  %v1034_v22 = vpop.f32.mrb[41].mxu1 }
 0x200   :  { %v2918_v5 = vpop.eup %2917  ;;  %v1666_v24 = vmax.f32 %v1602_v11, -1.0  ;;  %v1667_v25 = vmax.f32 %v3467_v36, %v1602_v11  ;;  %v1765_v26 = vsel %vm1762_vm2, %v1763_v12, %v3463_v6  ;;  %v1772_v14 = vrot.slane %v3476_v33, 2  ;;  %1443 = vst [vmem:[#allocation2 + $0x38] sm:$0xff] %v3488_v15  ;;  %v2788_v56 = vpop.f32.mrb[42].mxu1 }
 0x201   :  { %v2920_v18 = vpop.eup %2919  ;;  %v1927_v48 = vmax.f32 %v1670_v3, %v1769_v10  ;;  %v1928_v21 = vmax.f32 %v1671_v17, %v1771_v20  ;;  %v1672_v61 = vmax.f32 %v1605_v59, -1.0  ;;  %v1673_v32 = vmax.f32 %v3476_v33, %v1605_v59  ;;  %v1037_v29 = vpop.f32.mrb[43].mxu1 }
 0x202   :  { %v2922_v34 = vpop.eup %2921  ;;  %v1923_v35 = vmax.f32 %v1666_v24, %v1763_v12  ;;  %v1924_v19 = vmax.f32 %v1667_v25, %v1765_v26  ;;  %v1774_v37 = vsel %vm1762_vm2, %v1772_v14, %v3463_v6  ;;  %v2346_v39 = vsel %vm2342_vm1, %v3476_v33, %v3435_v30 }
 0x203   :  { %v2924_v41 = vpop.eup %2923  ;;  %1991 = vst [vmem:[#allocation2 + $0x49] sm:$0x80] %v1927_v48  ;;  %1992 = vst [vmem:[#allocation2 + $0x51] sm:$0x7f] %v1928_v21  ;;  %v1929_v43 = vmax.f32 %v1672_v61, %v1772_v14  ;;  %v1930_v44 = vmax.f32 %v1673_v32, %v1774_v37  ;;  %v1603_v46 = vrot.slane %v3488_v15, 1  ;;  %v1766_v45 = vrot.slane %v3488_v15, 2 }
 0x204   :  { %2378 = vst [vmem:[%s4356_s5 + $0x18] sm:$0xff] %v2346_v39  ;;  %1987 = vst [vmem:[#allocation2 + $0x19] sm:$0x80] %v1923_v35  ;;  %v2344_v30 = vsel %vm2342_vm1, %v3488_v15, %v3439_v55  ;;  %v1231_v23 = vadd.f32 1.0, %v2918_v5  ;;  %v1229_v31 = vadd.f32 1.0, %v2920_v18  ;;  %v1232_v50 = vadd.f32 1.0, %v2922_v34 }
 0x205   :  { %1988 = vst [vmem:[#allocation2 + $0x21] sm:$0x7f] %v1924_v19  ;;  %1993 = vst [vmem:[#allocation2 + $0x61] sm:$0x80] %v1929_v43  ;;  %v1668_v51 = vmax.f32 %v1603_v46, -1.0  ;;  %v1669_v52 = vmax.f32 %v3488_v15, %v1603_v46  ;;  %v1768_v53 = vsel %vm1762_vm2, %v1766_v45, %v3463_v6  ;;  %v1230_v38 = vadd.f32 1.0, %v2924_v41 }
 0x206   :  { %1994 = vst [vmem:[#allocation2 + $0x69] sm:$0x7f] %v1930_v44  ;;  %2376 = vst [vmem:[%s4356_s5 + $0x8] sm:$0xff] %v2344_v30  ;;  %2925 = vrcp.f32 %v1231_v23  ;;  %v3526_v57 = vadd.f32 %v2787_v13, %v3425_v27  ;;  %v3529_v55 = vadd.f32 %v3425_v27, %v1034_v22  ;;  %v3532_v40 = vadd.f32 %v2788_v56, %v3425_v27 }
 0x207   :  { %v1925_v58 = vmax.f32 %v1668_v51, %v1766_v45  ;;  %v1926_v49 = vmax.f32 %v1669_v52, %v1768_v53  ;;  %2927 = vrcp.f32 %v1229_v31  ;;  %v3535_v63 = vadd.f32 %v3425_v27, %v1037_v29 }
 0x208   :  { %2929 = vrcp.f32 %v1232_v50  ;;  %v1139_v1 = vsub.f32 0.0, %v3526_v57  ;;  %v1137_v0 = vsub.f32 0.0, %v3529_v55  ;;  %v1140_v2 = vsub.f32 0.0, %v3532_v40 }
 0x209   :  { %1989 = vst [vmem:[#allocation2 + $0x31] sm:$0x80] %v1925_v58  ;;  %1990 = vst [vmem:[#allocation2 + $0x39] sm:$0x7f] %v1926_v49  ;;  %2931 = vrcp.f32 %v1230_v38  ;;  %v1138_v8 = vsub.f32 0.0, %v3535_v63 }
 0x20a   :  { %v1181_v28 = vmul.f32 1.442695, %v1139_v1  ;;  %v1177_v9 = vmul.f32 1.442695, %v1137_v0  ;;  %v1183_v42 = vmul.f32 1.442695, %v1140_v2 }
 0x20b   :  { %v1179_v11 = vmul.f32 1.442695, %v1138_v8  ;;  %v3543_v17 = vld [vmem:[#allocation2 + $0x50] sm:$0xff] }
 0x20c   :  { %v2083_v10 = vld [vmem:[#allocation2 + $0x20] sm:$0xff]  ;;  %2933 = vpow2.f32 %v1181_v28 }
 0x20d   :  { %v2115_v12 = vmax.f32 %v2083_v10, -1.0  ;;  %2935 = vpow2.f32 %v1177_v9  ;;  %v3562_v21 = vld [vmem:[#allocation2 + $0x68] sm:$0xff] }
 0x20e   :  { %v2791_v62 = vpop.f32.mrb[44].mxu1  ;;  %2937 = vpow2.f32 %v1183_v42 }
 0x20f   :  { %v1050_v13 = vpop.f32.mrb[45].mxu1  ;;  %2939 = vpow2.f32 %v1179_v11  ;;  %v3546_v59 = vadd.f32 %v2791_v62, %v3425_v27 }
 0x210   :  { %v3541_v3 = vpop.eup %2925  ;;  %v2053_v20 = vld [vmem:[#allocation2 + $0x38] sm:$0xff]  ;;  %v3549_v22 = vadd.f32 %v3425_v27, %v1050_v13  ;;  %v3551_v5 = vpop.f32.mrb[46].mxu1 }
 0x211   :  { %v3553_v24 = vpop.eup %2927  ;;  %v2116_v25 = vmax.f32 %v2083_v10, %v2053_v20  ;;  %v2117_v26 = vmax.f32 %v2053_v20, %v3543_v17  ;;  %v2180_v14 = vmax.f32 %v2115_v12, %v2053_v20  ;;  %1448 = vst [vmem:[#allocation2 + $0xb0] sm:$0xff] %v3541_v3  ;;  %v1608_v56 = vrot.slane %v3541_v3, 1  ;;  %v3558_v18 = vpop.f32.mrb[47].mxu1 }
 0x212   :  { %v3560_v48 = vpop.eup %2929  ;;  %v1781_v61 = vrot.slane %v3541_v3, 2  ;;  %v2349_v32 = vsel %vm2342_vm1, %v3541_v3, %v3444_v16  ;;  %1446 = vst [vmem:[#allocation2 + $0x80] sm:$0xff] %v3553_v24  ;;  %v1606_v29 = vrot.slane %v3553_v24, 1  ;;  %v1775_v34 = vrot.slane %v3553_v24, 2 }
 0x213   :  { %v3572_v35 = vpop.eup %2931  ;;  %v2181_v19 = vmax.f32 %v2116_v25, %v3543_v17  ;;  %v2182_v37 = vmax.f32 %v2117_v26, %v3562_v21  ;;  %vm2212_vm3 = vcmp.eq.f32.partialorder %v2180_v14, %v3467_v36  ;;  %v1678_v39 = vmax.f32 %v1608_v56, -1.0  ;;  %2381 = vst [vmem:[%s4356_s5 + $0x30] sm:$0xff] %v2349_v32  ;;  %1449 = vst [vmem:[#allocation2 + $0xc8] sm:$0xff] %v3560_v48 }
 0x214   :  { %v3032_v16 = vmov 0.0   ;;  %v1679_v43 = vmax.f32 %v3541_v3, %v1608_v56  ;;  %v1783_v44 = vsel %vm1762_vm2, %v1781_v61, %v3463_v6  ;;  %v1674_v46 = vmax.f32 %v1606_v29, -1.0  ;;  %1447 = vst [vmem:[#allocation2 + $0x98] sm:$0xff] %v3572_v35 }
 0x215   :  { %v2539_v41 = vsel %vm2212_vm3, 1.0, %v3032_v16  ;;  %vm2213_vm4 = vcmp.eq.f32.partialorder %v2181_v19, %v3488_v15  ;;  %vm2214_vm5 = vcmp.eq.f32.partialorder %v2182_v37, %v3465_v7  ;;  %v1935_v30 = vmax.f32 %v1678_v39, %v1781_v61 }
 0x216   :  { %v2308_v45 = vmul.f32 %v3467_v36, %v2539_v41  ;;  %v2540_v23 = vsel %vm2213_vm4, 1.0, %v3032_v16  ;;  %v2541_v31 = vsel %vm2214_vm5, 1.0, %v3032_v16  ;;  %v1936_v50 = vmax.f32 %v1679_v43, %v1783_v44  ;;  %v2934_v52 = vpop.eup %2933 }
 0x217   :  { %v1675_v51 = vmax.f32 %v3553_v24, %v1606_v29  ;;  %v2309_v53 = vmul.f32 %v3488_v15, %v2540_v23  ;;  %v2310_v38 = vmul.f32 %v3465_v7, %v2541_v31  ;;  %1999 = vst [vmem:[#allocation2 + $0xa9] sm:$0x80] %v1935_v30  ;;  %v1777_v36 = vsel %vm1762_vm2, %v1775_v34, %v3463_v6  ;;  %v2936_v49 = vpop.eup %2935 }
 0x218   :  { %2407 = vst [vmem:[%s4357_s6] sm:$0xff] %v2308_v45  ;;  %v1931_v58 = vmax.f32 %v1674_v46, %v1775_v34  ;;  %2000 = vst [vmem:[#allocation2 + $0xb1] sm:$0x7f] %v1936_v50  ;;  %v2347_v0 = vsel %vm2342_vm1, %v3553_v24, %v3447_v47  ;;  %v1609_v15 = vrot.slane %v3560_v48, 1  ;;  %v1784_v7 = vrot.slane %v3560_v48, 2  ;;  %v2938_v2 = vpop.eup %2937 }
 0x219   :  { %v1932_v1 = vmax.f32 %v1675_v51, %v1777_v36  ;;  %2408 = vst [vmem:[%s4357_s6 + $0x8] sm:$0xff] %v2309_v53  ;;  %2409 = vst [vmem:[%s4357_s6 + $0x10] sm:$0xff] %v2310_v38  ;;  %v2350_v47 = vsel %vm2342_vm1, %v3560_v48, %v3451_v54  ;;  %v1607_v8 = vrot.slane %v3572_v35, 1  ;;  %v1778_v28 = vrot.slane %v3572_v35, 2  ;;  %v2940_v10 = vpop.eup %2939 }
 0x21a   :  { %1995 = vst [vmem:[#allocation2 + $0x79] sm:$0x80] %v1931_v58  ;;  %2379 = vst [vmem:[%s4356_s5 + $0x20] sm:$0xff] %v2347_v0  ;;  %v2348_v9 = vsel %vm2342_vm1, %v3572_v35, %v3455_v60  ;;  %v1680_v42 = vmax.f32 %v1609_v15, -1.0  ;;  %v1681_v11 = vmax.f32 %v3560_v48, %v1609_v15  ;;  %v1786_v12 = vsel %vm1762_vm2, %v1784_v7, %v3463_v6 }
 0x21b   :  { %1996 = vst [vmem:[#allocation2 + $0x81] sm:$0x7f] %v1932_v1  ;;  %2382 = vst [vmem:[%s4356_s5 + $0x38] sm:$0xff] %v2350_v47  ;;  %v1235_v54 = vadd.f32 1.0, %v2934_v52  ;;  %v1676_v62 = vmax.f32 %v1607_v8, -1.0  ;;  %v1677_v60 = vmax.f32 %v3572_v35, %v1607_v8  ;;  %v1780_v13 = vsel %vm1762_vm2, %v1778_v28, %v3463_v6 }
 0x21c   :  { %2380 = vst [vmem:[%s4356_s5 + $0x28] sm:$0xff] %v2348_v9  ;;  %v1233_v20 = vadd.f32 1.0, %v2936_v49  ;;  %v1937_v25 = vmax.f32 %v1680_v42, %v1784_v7  ;;  %v1938_v26 = vmax.f32 %v1681_v11, %v1786_v12  ;;  %v1236_v14 = vadd.f32 1.0, %v2938_v2 }
 0x21d   :  { %2941 = vrcp.f32 %v1235_v54  ;;  %v1933_v56 = vmax.f32 %v1676_v62, %v1778_v28  ;;  %v1934_v61 = vmax.f32 %v1677_v60, %v1780_v13  ;;  %v1234_v32 = vadd.f32 1.0, %v2940_v10 }
 0x21e   :  { %2943 = vrcp.f32 %v1233_v20  ;;  %2001 = vst [vmem:[#allocation2 + $0xc1] sm:$0x80] %v1937_v25  ;;  %2002 = vst [vmem:[#allocation2 + $0xc9] sm:$0x7f] %v1938_v26  ;;  %v1143_v29 = vsub.f32 0.0, %v3546_v59  ;;  %v1141_v34 = vsub.f32 0.0, %v3549_v22  ;;  %v3640_v19 = vadd.f32 %v3551_v5, %v3425_v27 }
 0x21f   :  { %2945 = vrcp.f32 %v1236_v14  ;;  %v2795_v37 = vpop.f32.mrb[48].mxu1  ;;  %v2118_v39 = vmax.f32 %v3543_v17, %v3562_v21  ;;  %1997 = vst [vmem:[#allocation2 + $0x91] sm:$0x80] %v1933_v56  ;;  %1998 = vst [vmem:[#allocation2 + $0x99] sm:$0x7f] %v1934_v61  ;;  %v3646_v41 = vadd.f32 %v3425_v27, %v3558_v18  ;;  %v2089_v1 = vld [vmem:[#allocation2 + $0xb0] sm:$0xff] }
 0x220   :  { %2947 = vrcp.f32 %v1234_v32  ;;  %v3649_v43 = vadd.f32 %v2795_v37, %v3425_v27  ;;  %v1066_v44 = vpop.f32.mrb[49].mxu1  ;;  %v1189_v46 = vmul.f32 1.442695, %v1143_v29  ;;  %v1185_v45 = vmul.f32 1.442695, %v1141_v34 }
 0x221   :  { %v1144_v5 = vsub.f32 0.0, %v3640_v19  ;;  %v3653_v30 = vadd.f32 %v3425_v27, %v1066_v44  ;;  %v2796_v23 = vpop.f32.mrb[50].mxu1  ;;  %v1142_v31 = vsub.f32 0.0, %v3646_v41 }
 0x222   :  { %v2087_v17 = vld [vmem:[#allocation2 + $0x80] sm:$0xff]  ;;  %v1147_v50 = vsub.f32 0.0, %v3649_v43  ;;  %v3658_v18 = vadd.f32 %v2796_v23, %v3425_v27  ;;  %v1069_v51 = vpop.f32.mrb[51].mxu1  ;;  %2949 = vpow2.f32 %v1189_v46 }
 0x223   :  { %v2119_v52 = vmax.f32 %v3562_v21, %v2087_v17  ;;  %v2183_v53 = vmax.f32 %v2118_v39, %v2087_v17  ;;  %v1191_v38 = vmul.f32 1.442695, %v1144_v5  ;;  %2951 = vpow2.f32 %v1185_v45 }
 0x224   :  { %v1187_v36 = vmul.f32 1.442695, %v1142_v31  ;;  %v1197_v58 = vmul.f32 1.442695, %v1147_v50  ;;  %v1145_v49 = vsub.f32 0.0, %v3653_v30  ;;  %v1148_v7 = vsub.f32 0.0, %v3658_v18 }
 0x225   :  { %vm2215_vm6 = vcmp.eq.f32.partialorder %v2183_v53, %v3476_v33  ;;  %2953 = vpow2.f32 %v1191_v38  ;;  %v2090_v15 = vld [vmem:[#allocation2 + $0xc8] sm:$0xff]  ;;  %v3666_v21 = vadd.f32 %v3425_v27, %v1069_v51 }
 0x226   :  { %v2542_v0 = vsel %vm2215_vm6, 1.0, %v3032_v16  ;;  %2955 = vpow2.f32 %v1187_v36  ;;  %v2122_v8 = vmax.f32 %v2089_v1, %v2090_v15  ;;  %v2057_v28 = vld [vmem:[#allocation2 + $0x98] sm:$0xff]  ;;  %v3671_v9 = vmul.f32 1.442695, %v1145_v49 }
 0x227   :  { %v3668_v2 = vpop.eup %2941  ;;  %v2311_v47 = vmul.f32 %v3476_v33, %v2542_v0  ;;  %2957 = vpow2.f32 %v1197_v58  ;;  %v2120_v42 = vmax.f32 %v2087_v17, %v2057_v28  ;;  %v2121_v11 = vmax.f32 %v2057_v28, %v2089_v1 }
 0x228   :  { %v3673_v10 = vpop.eup %2943  ;;  %v2184_v12 = vmax.f32 %v2119_v52, %v2057_v28  ;;  %1452 = vst [vmem:[#allocation2 + $0x140] sm:$0xff] %v3668_v2  ;;  %v1612_v54 = vrot.slane %v3668_v2, 1  ;;  %v2187_v33 = vmax.f32 %v2122_v8, -1.0  ;;  %v1793_v60 = vrot.slane %v3668_v2, 2 }
 0x229   :  { %v3677_v62 = vpop.eup %2945  ;;  %2410 = vst [vmem:[%s4357_s6 + $0x18] sm:$0xff] %v2311_v47  ;;  %v2353_v13 = vsel %vm2342_vm1, %v3668_v2, %v3526_v57  ;;  %1450 = vst [vmem:[#allocation2 + $0x110] sm:$0xff] %v3673_v10  ;;  %v1610_v20 = vrot.slane %v3673_v10, 1  ;;  %v2185_v26 = vmax.f32 %v2120_v42, %v2089_v1  ;;  %v2186_v14 = vmax.f32 %v2121_v11, %v2090_v15 }
 0x22a   :  { %v3689_v25 = vpop.eup %2947  ;;  %vm2216_vm7 = vcmp.eq.f32.partialorder %v2184_v12, %v3553_v24  ;;  %v1686_v56 = vmax.f32 %v1612_v54, -1.0  ;;  %2385 = vst [vmem:[%s4356_s5 + $0x50] sm:$0xff] %v2353_v13  ;;  %1453 = vst [vmem:[#allocation2 + $0x158] sm:$0xff] %v3677_v62  ;;  %vm2219_vm8 = vcmp.eq.f32.partialorder %v2187_v33, %v3560_v48  ;;  %v1687_v61 = vmax.f32 %v3668_v2, %v1612_v54 }
 0x22b   :  { %v2543_v57 = vsel %vm2216_vm7, 1.0, %v3032_v16  ;;  %v1795_v32 = vsel %vm1762_vm2, %v1793_v60, %v3463_v6  ;;  %1451 = vst [vmem:[#allocation2 + $0x128] sm:$0xff] %v3689_v25  ;;  %v2546_v29 = vsel %vm2219_vm8, 1.0, %v3032_v16  ;;  %vm2217_vm9 = vcmp.eq.f32.partialorder %v2185_v26, %v3572_v35 }
 0x22c   :  { %vm2218_vm10 = vcmp.eq.f32.partialorder %v2186_v14, %v3541_v3  ;;  %v2312_v34 = vmul.f32 %v3553_v24, %v2543_v57  ;;  %v2950_v37 = vpop.eup %2949  ;;  %v2315_v39 = vmul.f32 %v3560_v48, %v2546_v29  ;;  %v2544_v44 = vsel %vm2217_vm9, 1.0, %v3032_v16 }
 0x22d   :  { %v2545_v46 = vsel %vm2218_vm10, 1.0, %v3032_v16  ;;  %v1943_v45 = vmax.f32 %v1686_v56, %v1793_v60  ;;  %v2952_v5 = vpop.eup %2951  ;;  %v2313_v23 = vmul.f32 %v3572_v35, %v2544_v44  ;;  %v1944_v31 = vmax.f32 %v1687_v61, %v1795_v32 }
 0x22e   :  { %v2314_v17 = vmul.f32 %v3541_v3, %v2545_v46  ;;  %2411 = vst [vmem:[%s4357_s6 + $0x20] sm:$0xff] %v2312_v34  ;;  %v1682_v50 = vmax.f32 %v1610_v20, -1.0  ;;  %2414 = vst [vmem:[%s4357_s6 + $0x38] sm:$0xff] %v2315_v39  ;;  %v1683_v48 = vmax.f32 %v3673_v10, %v1610_v20  ;;  %v1787_v51 = vrot.slane %v3673_v10, 2  ;;  %v2799_v52 = vpop.f32.mrb[52].mxu1 }
 0x22f   :  { %v2954_v24 = vpop.eup %2953  ;;  %2007 = vst [vmem:[#allocation2 + $0x139] sm:$0x80] %v1943_v45  ;;  %v2351_v3 = vsel %vm2342_vm1, %v3673_v10, %v3529_v55  ;;  %v1613_v35 = vrot.slane %v3677_v62, 1  ;;  %2412 = vst [vmem:[%s4357_s6 + $0x28] sm:$0xff] %v2313_v23  ;;  %v1796_v38 = vrot.slane %v3677_v62, 2  ;;  %v2354_v55 = vsel %vm2342_vm1, %v3677_v62, %v3532_v40  ;;  %v1082_v49 = vpop.f32.mrb[53].mxu1 }
 0x230   :  { %v2956_v53 = vpop.eup %2955  ;;  %2413 = vst [vmem:[%s4357_s6 + $0x30] sm:$0xff] %v2314_v17  ;;  %2008 = vst [vmem:[#allocation2 + $0x141] sm:$0x7f] %v1944_v31  ;;  %v1611_v36 = vrot.slane %v3689_v25, 1  ;;  %v1790_v58 = vrot.slane %v3689_v25, 2  ;;  %v1789_v0 = vsel %vm1762_vm2, %v1787_v51, %v3463_v6  ;;  %v1939_v15 = vmax.f32 %v1682_v50, %v1787_v51  ;;  %v2800_v28 = vpop.f32.mrb[54].mxu1 }
 0x231   :  { %2383 = vst [vmem:[%s4356_s5 + $0x40] sm:$0xff] %v2351_v3  ;;  %v2958_v1 = vpop.eup %2957  ;;  %v1688_v47 = vmax.f32 %v1613_v35, -1.0  ;;  %v1689_v8 = vmax.f32 %v3677_v62, %v1613_v35  ;;  %2386 = vst [vmem:[%s4356_s5 + $0x58] sm:$0xff] %v2354_v55  ;;  %v1940_v42 = vmax.f32 %v1683_v48, %v1789_v0  ;;  %v1798_v40 = vsel %vm1762_vm2, %v1796_v38, %v3463_v6  ;;  %v1085_v54 = vpop.f32.mrb[55].mxu1 }
 0x232   :  { %v1684_v11 = vmax.f32 %v1611_v36, -1.0  ;;  %v1685_v12 = vmax.f32 %v3689_v25, %v1611_v36  ;;  %2003 = vst [vmem:[#allocation2 + $0x109] sm:$0x80] %v1939_v15  ;;  %v1792_v13 = vsel %vm1762_vm2, %v1790_v58, %v3463_v6  ;;  %v2352_v20 = vsel %vm2342_vm1, %v3689_v25, %v3535_v63 }
 0x233   :  { %v1945_v33 = vmax.f32 %v1688_v47, %v1796_v38  ;;  %v1946_v60 = vmax.f32 %v1689_v8, %v1798_v40  ;;  %2004 = vst [vmem:[#allocation2 + $0x111] sm:$0x7f] %v1940_v42  ;;  %2384 = vst [vmem:[%s4356_s5 + $0x48] sm:$0xff] %v2352_v20  ;;  %v1239_v56 = vadd.f32 1.0, %v2950_v37  ;;  %v1237_v57 = vadd.f32 1.0, %v2952_v5 }
 0x234   :  { %v1941_v26 = vmax.f32 %v1684_v11, %v1790_v58  ;;  %v1942_v14 = vmax.f32 %v1685_v12, %v1792_v13  ;;  %v1240_v61 = vadd.f32 1.0, %v2954_v24  ;;  %v1238_v32 = vadd.f32 1.0, %v2956_v53 }
 0x235   :  { %2009 = vst [vmem:[#allocation2 + $0x151] sm:$0x80] %v1945_v33  ;;  %2010 = vst [vmem:[#allocation2 + $0x159] sm:$0x7f] %v1946_v60  ;;  %v1243_v29 = vadd.f32 1.0, %v2958_v1  ;;  %2959 = vpow2.f32 %v3671_v9  ;;  %v1146_v63 = vsub.f32 0.0, %v3666_v21  ;;  %v3761_v34 = vadd.f32 %v2799_v52, %v3425_v27 }
 0x236   :  { %2005 = vst [vmem:[#allocation2 + $0x121] sm:$0x80] %v1941_v26  ;;  %2006 = vst [vmem:[#allocation2 + $0x129] sm:$0x7f] %v1942_v14  ;;  %2961 = vrcp.f32 %v1239_v56  ;;  %v3764_v39 = vadd.f32 %v3425_v27, %v1082_v49  ;;  %v1199_v37 = vmul.f32 1.442695, %v1148_v7  ;;  %v3769_v44 = vadd.f32 %v2800_v28, %v3425_v27 }
 0x237   :  { %2963 = vrcp.f32 %v1237_v57  ;;  %v3772_v9 = vadd.f32 %v3425_v27, %v1085_v54  ;;  %v1195_v46 = vmul.f32 1.442695, %v1146_v63  ;;  %v1151_v45 = vsub.f32 0.0, %v3761_v34  ;;  %v3778_v51 = vld [vmem:[#allocation2 + $0x140] sm:$0xff]  ;;  %v3824_v14 = vld [vmem:[#allocation2 + $0x48] sm:$0xff] }
 0x238   :  { %2965 = vrcp.f32 %v1240_v61  ;;  %v1149_v5 = vsub.f32 0.0, %v3764_v39  ;;  %v1152_v23 = vsub.f32 0.0, %v3769_v44 }
 0x239   :  { %2967 = vrcp.f32 %v1238_v32  ;;  %v1205_v17 = vmul.f32 1.442695, %v1151_v45  ;;  %v1150_v24 = vsub.f32 0.0, %v3772_v9 }
 0x23a   :  { %2969 = vrcp.f32 %v1243_v29  ;;  %v1201_v31 = vmul.f32 1.442695, %v1149_v5  ;;  %v2091_v50 = vld [vmem:[#allocation2 + $0x110] sm:$0xff]  ;;  %v1207_v7 = vmul.f32 1.442695, %v1152_v23 }
 0x23b   :  { %2971 = vpow2.f32 %v1199_v37  ;;  %v2123_v48 = vmax.f32 %v2091_v50, -1.0  ;;  %v3783_v36 = vmul.f32 1.442695, %v1150_v24 }
 0x23c   :  { %2973 = vpow2.f32 %v1195_v46  ;;  %v3781_v55 = vld [vmem:[#allocation2 + $0x158] sm:$0xff] }
 0x23d   :  { %v2061_v3 = vld [vmem:[#allocation2 + $0x128] sm:$0xff]  ;;  %2975 = vpow2.f32 %v1205_v17 }
 0x23e   :  { %v2124_v35 = vmax.f32 %v2091_v50, %v2061_v3  ;;  %v2125_v52 = vmax.f32 %v2061_v3, %v3778_v51  ;;  %v2188_v53 = vmax.f32 %v2123_v48, %v2061_v3  ;;  %2977 = vpow2.f32 %v1201_v31  ;;  %v3785_v58 = vpop.f32.mrb[56].mxu1 }
 0x23f   :  { %v2960_v38 = vpop.eup %2959  ;;  %2979 = vpow2.f32 %v1207_v7  ;;  %v3794_v47 = vpop.f32.mrb[57].mxu1 }
 0x240   :  { %v3787_v49 = vpop.eup %2961  ;;  %v2189_v1 = vmax.f32 %v2124_v35, %v3778_v51  ;;  %v2190_v0 = vmax.f32 %v2125_v52, %v3781_v55  ;;  %vm2220_vm11 = vcmp.eq.f32.partialorder %v2188_v53, %v3673_v10  ;;  %v3792_v15 = vadd.f32 1.0, %v2960_v38  ;;  %v3806_v12 = vpop.f32.mrb[58].mxu1 }
 0x241   :  { %v3796_v8 = vpop.eup %2963  ;;  %v2547_v28 = vsel %vm2220_vm11, 1.0, %v3032_v16  ;;  %1456 = vst [vmem:[#allocation2 + $0x1a0] sm:$0xff] %v3787_v49  ;;  %v1616_v42 = vrot.slane %v3787_v49, 1  ;;  %v1805_v40 = vrot.slane %v3787_v49, 2  ;;  %v2357_v11 = vsel %vm2342_vm1, %v3787_v49, %v3546_v59  ;;  %v3818_v13 = vpop.f32.mrb[59].mxu1 }
 0x242   :  { %v3808_v54 = vpop.eup %2965  ;;  %vm2221_vm12 = vcmp.eq.f32.partialorder %v2189_v1, %v3689_v25  ;;  %vm2222_vm13 = vcmp.eq.f32.partialorder %v2190_v0, %v3668_v2  ;;  %v2316_v33 = vmul.f32 %v3673_v10, %v2547_v28  ;;  %2389 = vst [vmem:[%s4356_s5 + $0x70] sm:$0xff] %v2357_v11  ;;  %1454 = vst [vmem:[#allocation2 + $0x170] sm:$0xff] %v3796_v8  ;;  %v1614_v60 = vrot.slane %v3796_v8, 1 }
 0x243   :  { %v3820_v59 = vpop.eup %2967  ;;  %v2548_v20 = vsel %vm2221_vm12, 1.0, %v3032_v16  ;;  %v2549_v26 = vsel %vm2222_vm13, 1.0, %v3032_v16  ;;  %v1694_v10 = vmax.f32 %v3824_v14, %v1616_v42  ;;  %v1695_v56 = vmax.f32 %v3787_v49, %v1616_v42  ;;  %1457 = vst [vmem:[#allocation2 + $0x1b8] sm:$0xff] %v3808_v54 }
 0x244   :  { %v3829_v57 = vpop.eup %2969  ;;  %v2317_v61 = vmul.f32 %v3689_v25, %v2548_v20  ;;  %v2318_v32 = vmul.f32 %v3668_v2, %v2549_v26  ;;  %2415 = vst [vmem:[%s4357_s6 + $0x40] sm:$0xff] %v2316_v33  ;;  %v1807_v29 = vsel %vm1762_vm2, %v1805_v40, %v3463_v6  ;;  %v1690_v63 = vmax.f32 %v3824_v14, %v1614_v60 }
 0x245   :  { %1455 = vst [vmem:[#allocation2 + $0x188] sm:$0xff] %v3820_v59  ;;  %v2972_v37 = vpop.eup %2971  ;;  %v1951_v46 = vmax.f32 %v1694_v10, %v1805_v40  ;;  %v1952_v45 = vmax.f32 %v1695_v56, %v1807_v29  ;;  %v1691_v5 = vmax.f32 %v3796_v8, %v1614_v60  ;;  %v1799_v25 = vrot.slane %v3796_v8, 2  ;;  %1460 = vst [vmem:[#allocation2 + $0x230] sm:$0xff] %v3829_v57 }
 0x246   :  { %v2974_v2 = vpop.eup %2973  ;;  %2416 = vst [vmem:[%s4357_s6 + $0x48] sm:$0xff] %v2317_v61  ;;  %2417 = vst [vmem:[%s4357_s6 + $0x50] sm:$0xff] %v2318_v32  ;;  %v2355_v23 = vsel %vm2342_vm1, %v3796_v8, %v3549_v22  ;;  %v1617_v17 = vrot.slane %v3808_v54, 1  ;;  %v1808_v31 = vrot.slane %v3808_v54, 2  ;;  %v2358_v50 = vsel %vm2342_vm1, %v3808_v54, %v3640_v19 }
 0x247   :  { %v2976_v7 = vpop.eup %2975  ;;  %2015 = vst [vmem:[#allocation2 + $0x199] sm:$0x80] %v1951_v46  ;;  %2016 = vst [vmem:[#allocation2 + $0x1a1] sm:$0x7f] %v1952_v45  ;;  %v1801_v24 = vsel %vm1762_vm2, %v1799_v25, %v3463_v6  ;;  %v1947_v48 = vmax.f32 %v1690_v63, %v1799_v25  ;;  %v1615_v22 = vrot.slane %v3820_v59, 1  ;;  %v1802_v3 = vrot.slane %v3820_v59, 2 }
 0x248   :  { %2387 = vst [vmem:[%s4356_s5 + $0x60] sm:$0xff] %v2355_v23  ;;  %2390 = vst [vmem:[%s4356_s5 + $0x78] sm:$0xff] %v2358_v50  ;;  %v2978_v19 = vpop.eup %2977  ;;  %v1948_v35 = vmax.f32 %v1691_v5, %v1801_v24  ;;  %v1696_v52 = vmax.f32 %v3824_v14, %v1617_v17  ;;  %v1697_v53 = vmax.f32 %v3808_v54, %v1617_v17  ;;  %v1620_v60 = vrot.slane %v3829_v57, 1 }
 0x249   :  { %v1810_v38 = vsel %vm1762_vm2, %v1808_v31, %v3463_v6  ;;  %v2980_v1 = vpop.eup %2979  ;;  %2011 = vst [vmem:[#allocation2 + $0x169] sm:$0x80] %v1947_v48  ;;  %v1692_v0 = vmax.f32 %v3824_v14, %v1615_v22  ;;  %v1693_v28 = vmax.f32 %v3820_v59, %v1615_v22  ;;  %v1804_v42 = vsel %vm1762_vm2, %v1802_v3, %v3463_v6 }
 0x24a   :  { %v2356_v40 = vsel %vm2342_vm1, %v3820_v59, %v3646_v41  ;;  %2012 = vst [vmem:[#allocation2 + $0x171] sm:$0x7f] %v1948_v35  ;;  %v1953_v11 = vmax.f32 %v1696_v52, %v1808_v31  ;;  %v1954_v33 = vmax.f32 %v1697_v53, %v1810_v38  ;;  %v1817_v20 = vrot.slane %v3829_v57, 2 }
 0x24b   :  { %2388 = vst [vmem:[%s4356_s5 + $0x68] sm:$0xff] %v2356_v40  ;;  %v1949_v26 = vmax.f32 %v1692_v0, %v1802_v3  ;;  %v1950_v10 = vmax.f32 %v1693_v28, %v1804_v42  ;;  %v2361_v56 = vsel %vm2342_vm1, %v3829_v57, %v3649_v43  ;;  %2981 = vrcp.f32 %v3792_v15 }
 0x24c   :  { %2017 = vst [vmem:[#allocation2 + $0x1b1] sm:$0x80] %v1953_v11  ;;  %2018 = vst [vmem:[#allocation2 + $0x1b9] sm:$0x7f] %v1954_v33  ;;  %v1702_v41 = vmax.f32 %v3824_v14, %v1620_v60  ;;  %v1703_v61 = vmax.f32 %v3829_v57, %v1620_v60  ;;  %v1819_v32 = vsel %vm1762_vm2, %v1817_v20, %v3463_v6  ;;  %v1244_v29 = vadd.f32 1.0, %v2972_v37 }
 0x24d   :  { %2393 = vst [vmem:[%s4356_s5 + $0x90] sm:$0xff] %v2361_v56  ;;  %2013 = vst [vmem:[#allocation2 + $0x181] sm:$0x80] %v1949_v26  ;;  %v1242_v63 = vadd.f32 1.0, %v2974_v2  ;;  %v1247_v43 = vadd.f32 1.0, %v2976_v7  ;;  %v1245_v46 = vadd.f32 1.0, %v2978_v19  ;;  %v3900_v25 = vadd.f32 %v3785_v58, %v3425_v27 }
 0x24e   :  { %2014 = vst [vmem:[#allocation2 + $0x189] sm:$0x7f] %v1950_v10  ;;  %v1248_v15 = vadd.f32 1.0, %v2980_v1  ;;  %v1959_v45 = vmax.f32 %v1702_v41, %v1817_v20  ;;  %v1960_v5 = vmax.f32 %v1703_v61, %v1819_v32  ;;  %2983 = vrcp.f32 %v1244_v29  ;;  %v2807_v17 = vpop.f32.mrb[60].mxu1 }
 0x24f   :  { %2985 = vrcp.f32 %v1242_v63  ;;  %v3904_v23 = vadd.f32 %v3425_v27, %v3794_v47  ;;  %v3908_v37 = vadd.f32 %v3806_v12, %v3425_v27  ;;  %v3912_v2 = vadd.f32 %v3425_v27, %v3818_v13  ;;  %v3920_v50 = vpop.f32.mrb[61].mxu1 }
 0x250   :  { %v2126_v31 = vmax.f32 %v3778_v51, %v3781_v55  ;;  %2023 = vst [vmem:[#allocation2 + $0x229] sm:$0x80] %v1959_v45  ;;  %2024 = vst [vmem:[#allocation2 + $0x231] sm:$0x7f] %v1960_v5  ;;  %2987 = vrcp.f32 %v1247_v43  ;;  %v1155_v58 = vsub.f32 0.0, %v3900_v25  ;;  %v3918_v47 = vadd.f32 %v2807_v17, %v3425_v27  ;;  %v3925_v48 = vpop.f32.mrb[62].mxu1 }
 0x251   :  { %v2095_v12 = vld [vmem:[#allocation2 + $0x170] sm:$0xff]  ;;  %2989 = vrcp.f32 %v1245_v46  ;;  %v1153_v7 = vsub.f32 0.0, %v3904_v23  ;;  %v1156_v13 = vsub.f32 0.0, %v3908_v37  ;;  %v1154_v24 = vsub.f32 0.0, %v3912_v2  ;;  %v2097_v51 = vld [vmem:[#allocation2 + $0x1a0] sm:$0xff]  ;;  %v3928_v27 = vpop.f32.mrb[63].mxu1 }
 0x252   :  { %v2127_v22 = vmax.f32 %v3781_v55, %v2095_v12  ;;  %v2191_v3 = vmax.f32 %v2126_v31, %v2095_v12  ;;  %2991 = vrcp.f32 %v1248_v15  ;;  %v1213_v19 = vmul.f32 1.442695, %v1155_v58 }
 0x253   :  { %v2098_v35 = vld [vmem:[#allocation2 + $0x1b8] sm:$0xff]  ;;  %2993 = vpow2.f32 %v3783_v36  ;;  %v3931_v52 = vmul.f32 1.442695, %v1153_v7  ;;  %v3933_v53 = vmul.f32 1.442695, %v1156_v13  ;;  %v1159_v38 = vsub.f32 0.0, %v3918_v47 }
 0x254   :  { %vm2223_vm14 = vcmp.eq.f32.partialorder %v2191_v3, %v3677_v62  ;;  %v2130_v1 = vmax.f32 %v2097_v51, %v2098_v35  ;;  %2995 = vpow2.f32 %v1213_v19  ;;  %v3937_v55 = vmul.f32 1.442695, %v1154_v24 }
 0x255   :  { %v2065_v0 = vld [vmem:[#allocation2 + $0x188] sm:$0xff]  ;;  %v3939_v28 = vpop.eup %2981  ;;  %v2550_v42 = vsel %vm2223_vm14, 1.0, %v3032_v16 }
 0x256   :  { %v2128_v40 = vmax.f32 %v2095_v12, %v2065_v0  ;;  %v2129_v11 = vmax.f32 %v2065_v0, %v2097_v51  ;;  %v2192_v36 = vmax.f32 %v2127_v22, %v2065_v0  ;;  %v2319_v33 = vmul.f32 %v3677_v62, %v2550_v42  ;;  %1458 = vst [vmem:[#allocation2 + $0x200] sm:$0xff] %v3939_v28 }
 0x257   :  { %v2195_v60 = vmax.f32 %v2130_v1, %v3824_v14  ;;  %v1618_v20 = vrot.slane %v3939_v28, 1  ;;  %v1811_v26 = vrot.slane %v3939_v28, 2  ;;  %v2359_v41 = vsel %vm2342_vm1, %v3939_v28, %v3653_v30 }
 0x258   :  { %v2193_v10 = vmax.f32 %v2128_v40, %v2097_v51  ;;  %v2194_v56 = vmax.f32 %v2129_v11, %v2098_v35  ;;  %vm2224_vm15 = vcmp.eq.f32.partialorder %v2192_v36, %v3796_v8  ;;  %v3952_v61 = vpop.eup %2983  ;;  %2418 = vst [vmem:[%s4357_s6 + $0x58] sm:$0xff] %v2319_v33  ;;  %2391 = vst [vmem:[%s4356_s5 + $0x80] sm:$0xff] %v2359_v41 }
 0x259   :  { %vm2227_vm0 = vcmp.eq.f32.partialorder %v2195_v60, %v3808_v54  ;;  %v2551_v62 = vsel %vm2224_vm15, 1.0, %v3032_v16  ;;  %v1698_v32 = vmax.f32 %v3824_v14, %v1618_v20  ;;  %v1699_v29 = vmax.f32 %v3939_v28, %v1618_v20  ;;  %v3964_v63 = vpop.eup %2985  ;;  %1461 = vst [vmem:[#allocation2 + $0x248] sm:$0xff] %v3952_v61 }
 0x25a   :  { %v2554_v30 = vsel %vm2227_vm0, 1.0, %v3032_v16  ;;  %vm2225_vm3 = vcmp.eq.f32.partialorder %v2193_v10, %v3820_v59  ;;  %vm2226_vm4 = vcmp.eq.f32.partialorder %v2194_v56, %v3787_v49  ;;  %v2320_v43 = vmul.f32 %v3796_v8, %v2551_v62  ;;  %v3971_v46 = vpop.eup %2987  ;;  %1459 = vst [vmem:[#allocation2 + $0x218] sm:$0xff] %v3964_v63 }
 0x25b   :  { %v2323_v15 = vmul.f32 %v3808_v54, %v2554_v30  ;;  %v2552_v45 = vsel %vm2225_vm3, 1.0, %v3032_v16  ;;  %v2553_v5 = vsel %vm2226_vm4, 1.0, %v3032_v16  ;;  %v1813_v17 = vsel %vm1762_vm2, %v1811_v26, %v3463_v6  ;;  %v3979_v31 = vpop.eup %2989  ;;  %1464 = vst [vmem:[#allocation2 + $0x290] sm:$0xff] %v3971_v46 }
 0x25c   :  { %v2321_v58 = vmul.f32 %v3820_v59, %v2552_v45  ;;  %v2322_v8 = vmul.f32 %v3787_v49, %v2553_v5  ;;  %2419 = vst [vmem:[%s4357_s6 + $0x60] sm:$0xff] %v2320_v43  ;;  %v1955_v54 = vmax.f32 %v1698_v32, %v1811_v26  ;;  %v1956_v12 = vmax.f32 %v1699_v29, %v1813_v17  ;;  %v3987_v7 = vpop.eup %2991 }
 0x25d   :  { %2422 = vst [vmem:[%s4357_s6 + $0x78] sm:$0xff] %v2323_v15  ;;  %v1621_v13 = vrot.slane %v3952_v61, 1  ;;  %v1820_v59 = vrot.slane %v3952_v61, 2  ;;  %v2362_v49 = vsel %vm2342_vm1, %v3952_v61, %v3658_v18  ;;  %v1619_v24 = vrot.slane %v3964_v63, 1  ;;  %1462 = vst [vmem:[#allocation2 + $0x260] sm:$0xff] %v3979_v31  ;;  %v2994_v51 = vpop.eup %2993 }
 0x25e   :  { %2420 = vst [vmem:[%s4357_s6 + $0x68] sm:$0xff] %v2321_v58  ;;  %2421 = vst [vmem:[%s4357_s6 + $0x70] sm:$0xff] %v2322_v8  ;;  %v1814_v18 = vrot.slane %v3964_v63, 2  ;;  %v2360_v22 = vsel %vm2342_vm1, %v3964_v63, %v3666_v21  ;;  %v1624_v3 = vrot.slane %v3971_v46, 1  ;;  %v1829_v19 = vrot.slane %v3971_v46, 2  ;;  %v2996_v35 = vpop.eup %2995 }
 0x25f   :  { %2019 = vst [vmem:[#allocation2 + $0x1f9] sm:$0x80] %v1955_v54  ;;  %2020 = vst [vmem:[#allocation2 + $0x201] sm:$0x7f] %v1956_v12  ;;  %v1704_v1 = vmax.f32 %v3824_v14, %v1621_v13  ;;  %v1705_v0 = vmax.f32 %v3952_v61, %v1621_v13  ;;  %v1822_v42 = vsel %vm1762_vm2, %v1820_v59, %v3463_v6  ;;  %v1622_v29 = vrot.slane %v3979_v31, 1 }
 0x260   :  { %2394 = vst [vmem:[%s4356_s5 + $0x98] sm:$0xff] %v2362_v49  ;;  %1465 = vst [vmem:[#allocation2 + $0x2a8] sm:$0xff] %v3987_v7  ;;  %v1700_v40 = vmax.f32 %v3824_v14, %v1619_v24  ;;  %v1701_v21 = vmax.f32 %v3964_v63, %v1619_v24  ;;  %v1816_v11 = vsel %vm1762_vm2, %v1814_v18, %v3463_v6  ;;  %v1823_v30 = vrot.slane %v3979_v31, 2 }
 0x261   :  { %2392 = vst [vmem:[%s4356_s5 + $0x88] sm:$0xff] %v2360_v22  ;;  %v1710_v36 = vmax.f32 %v3824_v14, %v1624_v3  ;;  %v1711_v33 = vmax.f32 %v3971_v46, %v1624_v3  ;;  %v1961_v60 = vmax.f32 %v1704_v1, %v1820_v59  ;;  %v1962_v20 = vmax.f32 %v1705_v0, %v1822_v42  ;;  %v3030_v3 = vld [vmem:[%s4355_s4] ss:$0 sm:$0xff]  ;;  %v2070_v1 = vld [vmem:[#allocation2 + $0x230] sm:$0xff] }
 0x262   :  { %v1957_v26 = vmax.f32 %v1700_v40, %v1814_v18  ;;  %v1831_v10 = vsel %vm1762_vm2, %v1829_v19, %v3463_v6  ;;  %v1958_v56 = vmax.f32 %v1701_v21, %v1816_v11  ;;  %v2365_v32 = vsel %vm2342_vm1, %v3971_v46, %v3761_v34 }
 0x263   :  { %v1967_v41 = vmax.f32 %v1710_v36, %v1829_v19  ;;  %v1968_v62 = vmax.f32 %v1711_v33, %v1831_v10  ;;  %2025 = vst [vmem:[#allocation2 + $0x241] sm:$0x80] %v1961_v60  ;;  %2026 = vst [vmem:[#allocation2 + $0x249] sm:$0x7f] %v1962_v20  ;;  %v2363_v43 = vsel %vm2342_vm1, %v3979_v31, %v3764_v39  ;;  %v1625_v15 = vrot.slane %v3987_v7, 1 }
 0x264   :  { %2021 = vst [vmem:[#allocation2 + $0x211] sm:$0x80] %v1957_v26  ;;  %2397 = vst [vmem:[%s4356_s5 + $0xb0] sm:$0xff] %v2365_v32  ;;  %v1832_v34 = vrot.slane %v3987_v7, 2  ;;  %v2366_v45 = vsel %vm2342_vm1, %v3987_v7, %v3769_v44  ;;  %v1246_v5 = vadd.f32 1.0, %v2994_v51  ;;  %v1251_v17 = vadd.f32 1.0, %v2996_v35 }
 0x265   :  { %2022 = vst [vmem:[#allocation2 + $0x219] sm:$0x7f] %v1958_v56  ;;  %2031 = vst [vmem:[#allocation2 + $0x289] sm:$0x80] %v1967_v41  ;;  %v1706_v39 = vmax.f32 %v3824_v14, %v1622_v29  ;;  %v1707_v8 = vmax.f32 %v3979_v31, %v1622_v29  ;;  %v1825_v54 = vsel %vm1762_vm2, %v1823_v30, %v3463_v6  ;;  %v1221_v22 = vmul.f32 1.442695, %v1159_v38 }
 0x266   :  { %2032 = vst [vmem:[#allocation2 + $0x291] sm:$0x7f] %v1968_v62  ;;  %2395 = vst [vmem:[%s4356_s5 + $0xa0] sm:$0xff] %v2363_v43  ;;  %v2099_v58 = vld [vmem:[#allocation2 + $0x200] sm:$0xff]  ;;  %v1712_v12 = vmax.f32 %v3824_v14, %v1625_v15  ;;  %v1713_v44 = vmax.f32 %v3987_v7, %v1625_v15  ;;  %v1834_v59 = vsel %vm1762_vm2, %v1832_v34, %v3463_v6  ;;  %2997 = vrcp.f32 %v1246_v5 }
 0x267   :  { %2398 = vst [vmem:[%s4356_s5 + $0xb8] sm:$0xff] %v2366_v45  ;;  %v2131_v13 = vmax.f32 %v3824_v14, %v2099_v58  ;;  %v1963_v49 = vmax.f32 %v1706_v39, %v1823_v30  ;;  %v1964_v24 = vmax.f32 %v1707_v8, %v1825_v54  ;;  %2999 = vrcp.f32 %v1251_v17 }
 0x268   :  { %v1969_v51 = vmax.f32 %v1712_v12, %v1832_v34  ;;  %v1970_v18 = vmax.f32 %v1713_v44, %v1834_v59  ;;  %3001 = vpow2.f32 %v3931_v52  ;;  %v4073_v19 = vadd.f32 %v3030_v3, %v3920_v50 }
 0x269   :  { %2027 = vst [vmem:[#allocation2 + $0x259] sm:$0x80] %v1963_v49  ;;  %2028 = vst [vmem:[#allocation2 + $0x261] sm:$0x7f] %v1964_v24  ;;  %3003 = vpow2.f32 %v3933_v53  ;;  %v4077_v35 = vadd.f32 %v3030_v3, %v3925_v48  ;;  %v4080_v52 = vadd.f32 %v3030_v3, %v3928_v27 }
 0x26a   :  { %2033 = vst [vmem:[#allocation2 + $0x2a1] sm:$0x80] %v1969_v51  ;;  %2034 = vst [vmem:[#allocation2 + $0x2a9] sm:$0x7f] %v1970_v18  ;;  %3005 = vpow2.f32 %v3937_v55  ;;  %v1157_v38 = vsub.f32 0.0, %v4073_v19  ;;  %v4086_v40 = vld [vmem:[#allocation2 + $0x248] sm:$0xff] }
 0x26b   :  { %3007 = vpow2.f32 %v1221_v22  ;;  %v1160_v50 = vsub.f32 0.0, %v4077_v35  ;;  %v1158_v42 = vsub.f32 0.0, %v4080_v52  ;;  %v2134_v60 = vmax.f32 %v2070_v1, %v4086_v40 }
 0x26c   :  { %v2069_v0 = vld [vmem:[#allocation2 + $0x218] sm:$0xff]  ;;  %v1217_v11 = vmul.f32 1.442695, %v1157_v38 }
 0x26d   :  { %v2132_v53 = vmax.f32 %v2099_v58, %v2069_v0  ;;  %v2133_v48 = vmax.f32 %v2069_v0, %v2070_v1  ;;  %v2196_v21 = vmax.f32 %v2131_v13, %v2069_v0  ;;  %v1223_v27 = vmul.f32 1.442695, %v1160_v50  ;;  %v4103_v29 = vld [vmem:[#allocation2 + $0x290] sm:$0xff] }
 0x26e   :  { %v1219_v36 = vmul.f32 1.442695, %v1158_v42  ;;  %3009 = vpow2.f32 %v1217_v11 }
 0x26f   :  { %v2197_v33 = vmax.f32 %v2132_v53, %v2070_v1  ;;  %v2198_v55 = vmax.f32 %v2133_v48, %v4086_v40  ;;  %vm2228_vm5 = vcmp.eq.f32.partialorder %v2196_v21, %v3939_v28  ;;  %3011 = vpow2.f32 %v1223_v27 }
 0x270   :  { %v2555_v20 = vsel %vm2228_vm5, 1.0, %v3032_v16  ;;  %v4092_v26 = vpop.eup %2997  ;;  %v4097_v56 = vld [vmem:[#allocation2 + $0x260] sm:$0xff]  ;;  %3013 = vpow2.f32 %v1219_v36 }
 0x271   :  { %vm2229_vm6 = vcmp.eq.f32.partialorder %v2197_v33, %v3964_v63  ;;  %vm2230_vm7 = vcmp.eq.f32.partialorder %v2198_v55, %v3829_v57  ;;  %v2324_v10 = vmul.f32 %v3939_v28, %v2555_v20  ;;  %v4099_v41 = vpop.eup %2999  ;;  %v2199_v30 = vmax.f32 %v2134_v60, %v4097_v56  ;;  %v4106_v43 = vld [vmem:[#allocation2 + $0x2a8] sm:$0xff]  ;;  %1463 = vst [vmem:[#allocation2 + $0x278] sm:$0xff] %v4092_v26 }
 0x272   :  { %v2556_v62 = vsel %vm2229_vm6, 1.0, %v3032_v16  ;;  %v2557_v32 = vsel %vm2230_vm7, 1.0, %v3032_v16  ;;  %v3002_v15 = vpop.eup %3001  ;;  %v2138_v45 = vmax.f32 %v4103_v29, %v4106_v43  ;;  %v1623_v5 = vrot.slane %v4092_v26, 1  ;;  %1468 = vst [vmem:[#allocation2 + $0x320] sm:$0xff] %v4099_v41 }
 0x273   :  { %v2325_v28 = vmul.f32 %v3964_v63, %v2556_v62  ;;  %v2326_v34 = vmul.f32 %v3829_v57, %v2557_v32  ;;  %2423 = vst [vmem:[%s4357_s6 + $0x80] sm:$0xff] %v2324_v10  ;;  %v3004_v17 = vpop.eup %3003  ;;  %vm2231_vm8 = vcmp.eq.f32.partialorder %v2199_v30, %v3952_v61  ;;  %v1826_v58 = vrot.slane %v4092_v26, 2 }
 0x274   :  { %v2364_v57 = vsel %vm2342_vm1, %v4092_v26, %v3772_v9  ;;  %v1628_v63 = vrot.slane %v4099_v41, 1  ;;  %v3006_v39 = vpop.eup %3005  ;;  %v2558_v8 = vsel %vm2231_vm8, 1.0, %v3032_v16  ;;  %v2203_v54 = vmax.f32 %v2138_v45, %v3824_v14 }
 0x275   :  { %2424 = vst [vmem:[%s4357_s6 + $0x88] sm:$0xff] %v2325_v28  ;;  %2425 = vst [vmem:[%s4357_s6 + $0x90] sm:$0xff] %v2326_v34  ;;  %v1708_v12 = vmax.f32 %v3824_v14, %v1623_v5  ;;  %v1709_v13 = vmax.f32 %v4092_v26, %v1623_v5  ;;  %v3008_v9 = vpop.eup %3007  ;;  %v2327_v44 = vmul.f32 %v3952_v61, %v2558_v8  ;;  %v1841_v22 = vrot.slane %v4099_v41, 2 }
 0x276   :  { %2396 = vst [vmem:[%s4356_s5 + $0xa8] sm:$0xff] %v2364_v57  ;;  %v1828_v59 = vsel %vm1762_vm2, %v1826_v58, %v3463_v6  ;;  %v1718_v49 = vmax.f32 %v3824_v14, %v1628_v63  ;;  %v1719_v24 = vmax.f32 %v4099_v41, %v1628_v63  ;;  %vm2235_vm9 = vcmp.eq.f32.partialorder %v2203_v54, %v3987_v7 }
 0x277   :  { %v1965_v51 = vmax.f32 %v1708_v12, %v1826_v58  ;;  %v1966_v18 = vmax.f32 %v1709_v13, %v1828_v59  ;;  %2426 = vst [vmem:[%s4357_s6 + $0x98] sm:$0xff] %v2327_v44  ;;  %v2562_v3 = vsel %vm2235_vm9, 1.0, %v3032_v16  ;;  %v2369_v61 = vsel %vm2342_vm1, %v4099_v41, %v3900_v25 }
 0x278   :  { %v1249_v38 = vadd.f32 1.0, %v3002_v15  ;;  %v1252_v1 = vadd.f32 1.0, %v3004_v17  ;;  %v3010_v0 = vpop.eup %3009  ;;  %v2331_v50 = vmul.f32 %v3987_v7, %v2562_v3  ;;  %v1843_v42 = vsel %vm1762_vm2, %v1841_v22, %v3463_v6  ;;  %2401 = vst [vmem:[%s4356_s5 + $0xd0] sm:$0xff] %v2369_v61 }
 0x279   :  { %2029 = vst [vmem:[#allocation2 + $0x271] sm:$0x80] %v1965_v51  ;;  %2030 = vst [vmem:[#allocation2 + $0x279] sm:$0x7f] %v1966_v18  ;;  %v1975_v53 = vmax.f32 %v1718_v49, %v1841_v22  ;;  %v1250_v48 = vadd.f32 1.0, %v3006_v39  ;;  %v3012_v21 = vpop.eup %3011  ;;  %v1976_v11 = vmax.f32 %v1719_v24, %v1843_v42  ;;  %v1255_v25 = vadd.f32 1.0, %v3008_v9 }
 0x27a   :  { %3015 = vrcp.f32 %v1249_v38  ;;  %v1253_v27 = vadd.f32 1.0, %v3010_v0  ;;  %v3014_v36 = vpop.eup %3013  ;;  %2430 = vst [vmem:[%s4357_s6 + $0xb8] sm:$0xff] %v2331_v50  ;;  %v1256_v7 = vadd.f32 1.0, %v3012_v21  ;;  %v2135_v55 = vmax.f32 %v4086_v40, %v4097_v56 }
 0x27b   :  { %2039 = vst [vmem:[#allocation2 + $0x319] sm:$0x80] %v1975_v53  ;;  %3017 = vrcp.f32 %v1252_v1  ;;  %2040 = vst [vmem:[#allocation2 + $0x321] sm:$0x7f] %v1976_v11  ;;  %v1254_v33 = vadd.f32 1.0, %v3014_v36  ;;  %v1857_v28 = vrot.slane %v3824_v14, 2 }
 0x27c   :  { %3019 = vrcp.f32 %v1250_v48 }
 0x27d   :  { %3021 = vrcp.f32 %v1255_v25 }
 0x27e   :  { %3023 = vrcp.f32 %v1253_v27 }
 0x27f   :  { %3025 = vrcp.f32 %v1256_v7 }
 0x280   :  { %v2073_v60 = vld [vmem:[#allocation2 + $0x278] sm:$0xff]  ;;  %3027 = vrcp.f32 %v1254_v33 }
 0x281   :  { %v2136_v20 = vmax.f32 %v4097_v56, %v2073_v60  ;;  %v2137_v10 = vmax.f32 %v2073_v60, %v4103_v29  ;;  %v2200_v62 = vmax.f32 %v2135_v55, %v2073_v60 }
 0x283   :  { %v2201_v32 = vmax.f32 %v2136_v20, %v4103_v29  ;;  %v2202_v30 = vmax.f32 %v2137_v10, %v4106_v43  ;;  %vm2232_vm10 = vcmp.eq.f32.partialorder %v2200_v62, %v3979_v31 }
 0x284   :  { %v4169_v15 = vpop.eup %3015  ;;  %v2559_v40 = vsel %vm2232_vm10, 1.0, %v3032_v16 }
 0x285   :  { %v4173_v34 = vpop.eup %3017  ;;  %vm2233_vm11 = vcmp.eq.f32.partialorder %v2201_v32, %v4092_v26  ;;  %vm2234_vm12 = vcmp.eq.f32.partialorder %v2202_v30, %v3971_v46  ;;  %v2328_v56 = vmul.f32 %v3979_v31, %v2559_v40  ;;  %1466 = vst [vmem:[#allocation2 + $0x2f0] sm:$0xff] %v4169_v15  ;;  %v1626_v29 = vrot.slane %v4169_v15, 1 }
 0x286   :  { %v4180_v43 = vpop.eup %3019  ;;  %v2560_v45 = vsel %vm2233_vm11, 1.0, %v3032_v16  ;;  %v2561_v5 = vsel %vm2234_vm12, 1.0, %v3032_v16  ;;  %v1835_v17 = vrot.slane %v4169_v15, 2  ;;  %v2367_v58 = vsel %vm2342_vm1, %v4169_v15, %v3904_v23  ;;  %1469 = vst [vmem:[#allocation2 + $0x338] sm:$0xff] %v4173_v34 }
 0x287   :  { %v4190_v31 = vpop.eup %3021  ;;  %v2329_v57 = vmul.f32 %v4092_v26, %v2560_v45  ;;  %v2330_v63 = vmul.f32 %v3971_v46, %v2561_v5  ;;  %2427 = vst [vmem:[%s4357_s6 + $0xa0] sm:$0xff] %v2328_v56  ;;  %v1714_v39 = vmax.f32 %v3824_v14, %v1626_v29  ;;  %v1715_v8 = vmax.f32 %v4169_v15, %v1626_v29 }
 0x288   :  { %2399 = vst [vmem:[%s4356_s5 + $0xc0] sm:$0xff] %v2367_v58  ;;  %1467 = vst [vmem:[#allocation2 + $0x308] sm:$0xff] %v4180_v43  ;;  %v4203_v23 = vpop.eup %3023  ;;  %v1837_v26 = vsel %vm1762_vm2, %v1835_v17, %v3463_v6  ;;  %v1629_v46 = vrot.slane %v4173_v34, 1  ;;  %v1844_v54 = vrot.slane %v4173_v34, 2  ;;  %v2370_v12 = vsel %vm2342_vm1, %v4173_v34, %v3908_v37 }
 0x289   :  { %1472 = vst [vmem:[#allocation2 + $0x380] sm:$0xff] %v4190_v31  ;;  %v4214_v13 = vpop.eup %3025  ;;  %2428 = vst [vmem:[%s4357_s6 + $0xa8] sm:$0xff] %v2329_v57  ;;  %v1971_v9 = vmax.f32 %v1714_v39, %v1835_v17  ;;  %v1972_v44 = vmax.f32 %v1715_v8, %v1837_v26  ;;  %v1627_v37 = vrot.slane %v4180_v43, 1  ;;  %v1838_v59 = vrot.slane %v4180_v43, 2 }
 0x28a   :  { %2429 = vst [vmem:[%s4357_s6 + $0xb0] sm:$0xff] %v2330_v63  ;;  %2402 = vst [vmem:[%s4356_s5 + $0xd8] sm:$0xff] %v2370_v12  ;;  %v4228_v49 = vpop.eup %3027  ;;  %v1720_v24 = vmax.f32 %v3824_v14, %v1629_v46  ;;  %v1721_v51 = vmax.f32 %v4173_v34, %v1629_v46  ;;  %v1846_v18 = vsel %vm1762_vm2, %v1844_v54, %v3463_v6  ;;  %v1632_v1 = vrot.slane %v4190_v31, 1 }
 0x28b   :  { %1470 = vst [vmem:[#allocation2 + $0x350] sm:$0xff] %v4203_v23  ;;  %v2368_v22 = vsel %vm2342_vm1, %v4180_v43, %v3912_v2  ;;  %1473 = vst [vmem:[#allocation2 + $0x398] sm:$0xff] %v4214_v13  ;;  %v1716_v3 = vmax.f32 %v3824_v14, %v1627_v37  ;;  %v1717_v61 = vmax.f32 %v4180_v43, %v1627_v37  ;;  %v1853_v50 = vrot.slane %v4190_v31, 2 }
 0x28c   :  { %2035 = vst [vmem:[#allocation2 + $0x2e9] sm:$0x80] %v1971_v9  ;;  %2036 = vst [vmem:[#allocation2 + $0x2f1] sm:$0x7f] %v1972_v44  ;;  %v1840_v38 = vsel %vm1762_vm2, %v1838_v59, %v3463_v6  ;;  %v1977_v2 = vmax.f32 %v1720_v24, %v1844_v54  ;;  %v1978_v0 = vmax.f32 %v1721_v51, %v1846_v18  ;;  %v1630_v27 = vrot.slane %v4203_v23, 1 }
 0x28d   :  { %2400 = vst [vmem:[%s4356_s5 + $0xc8] sm:$0xff] %v2368_v22  ;;  %1471 = vst [vmem:[#allocation2 + $0x368] sm:$0xff] %v4228_v49  ;;  %v2373_v42 = vsel %vm2342_vm1, %v4190_v31, %v3918_v47  ;;  %v1973_v53 = vmax.f32 %v1716_v3, %v1838_v59  ;;  %v1974_v48 = vmax.f32 %v1717_v61, %v1840_v38  ;;  %v1847_v36 = vrot.slane %v4203_v23, 2 }
 0x28e   :  { %v1726_v21 = vmax.f32 %v3824_v14, %v1632_v1  ;;  %v1727_v11 = vmax.f32 %v4190_v31, %v1632_v1  ;;  %2405 = vst [vmem:[%s4356_s5 + $0xf0] sm:$0xff] %v2373_v42  ;;  %2041 = vst [vmem:[#allocation2 + $0x331] sm:$0x80] %v1977_v2  ;;  %v1855_v25 = vsel %vm1762_vm2, %v1853_v50, %v3463_v6  ;;  %v1633_v55 = vrot.slane %v4214_v13, 1 }
 0x28f   :  { %2042 = vst [vmem:[#allocation2 + $0x339] sm:$0x7f] %v1978_v0  ;;  %v2371_v47 = vsel %vm2342_vm1, %v4203_v23, %v4073_v19  ;;  %2037 = vst [vmem:[#allocation2 + $0x301] sm:$0x80] %v1973_v53  ;;  %v1856_v60 = vrot.slane %v4214_v13, 2  ;;  %v1722_v20 = vmax.f32 %v3824_v14, %v1630_v27  ;;  %v1723_v10 = vmax.f32 %v4203_v23, %v1630_v27 }
 0x290   :  { %2038 = vst [vmem:[#allocation2 + $0x309] sm:$0x7f] %v1974_v48  ;;  %v1983_v7 = vmax.f32 %v1726_v21, %v1853_v50  ;;  %v1984_v33 = vmax.f32 %v1727_v11, %v1855_v25  ;;  %2403 = vst [vmem:[%s4356_s5 + $0xe0] sm:$0xff] %v2371_v47  ;;  %v1849_v62 = vsel %vm1762_vm2, %v1847_v36, %v3463_v6  ;;  %v1631_v6 = vrot.slane %v4228_v49, 1 }
 0x291   :  { %v2374_v19 = vsel %vm2342_vm1, %v4214_v13, %v4077_v35  ;;  %v1728_v32 = vmax.f32 %v3824_v14, %v1633_v55  ;;  %v1729_v30 = vmax.f32 %v4214_v13, %v1633_v55  ;;  %v1858_v40 = vsel %vm1762_vm2, %v1856_v60, %v1857_v28 }
 0x292   :  { %2047 = vst [vmem:[#allocation2 + $0x379] sm:$0x80] %v1983_v7  ;;  %2048 = vst [vmem:[#allocation2 + $0x381] sm:$0x7f] %v1984_v33  ;;  %v1979_v29 = vmax.f32 %v1722_v20, %v1847_v36  ;;  %v1980_v45 = vmax.f32 %v1723_v10, %v1849_v62  ;;  %v1850_v35 = vrot.slane %v4228_v49, 2  ;;  %v2372_v5 = vsel %vm2342_vm1, %v4228_v49, %v4080_v52  ;;  %v2078_v52 = vld [vmem:[#allocation2 + $0x320] sm:$0xff] }
 0x293   :  { %2406 = vst [vmem:[%s4356_s5 + $0xf8] sm:$0xff] %v2374_v19  ;;  %v2107_v56 = vld [vmem:[#allocation2 + $0x2f0] sm:$0xff]  ;;  %v1985_v58 = vmax.f32 %v1728_v32, %v1856_v60  ;;  %v1986_v57 = vmax.f32 %v1729_v30, %v1858_v40  ;;  %v1724_v63 = vmax.f32 %v3824_v14, %v1631_v6  ;;  %2404 = vst [vmem:[%s4356_s5 + $0xe8] sm:$0xff] %v2372_v5 }
 0x294   :  { %v2139_v17 = vmax.f32 %v3824_v14, %v2107_v56  ;;  %2043 = vst [vmem:[#allocation2 + $0x349] sm:$0x80] %v1979_v29  ;;  %2044 = vst [vmem:[#allocation2 + $0x351] sm:$0x7f] %v1980_v45  ;;  %v1725_v39 = vmax.f32 %v4228_v49, %v1631_v6  ;;  %v1852_v8 = vsel %vm1762_vm2, %v1850_v35, %v1857_v28 }
 0x295   :  { %2049 = vst [vmem:[#allocation2 + $0x391] sm:$0x80] %v1985_v58  ;;  %2050 = vst [vmem:[#allocation2 + $0x399] sm:$0x7f] %v1986_v57  ;;  %v1981_v4 = vmax.f32 %v1724_v63, %v1850_v35 }
 0x296   :  { %v1982_v46 = vmax.f32 %v1725_v39, %v1852_v8  ;;  %v2079_v54 = vld [vmem:[#allocation2 + $0x338] sm:$0xff] }
 0x297   :  { %v2077_v26 = vld [vmem:[#allocation2 + $0x308] sm:$0xff]  ;;  %2045 = vst [vmem:[#allocation2 + $0x361] sm:$0x80] %v1981_v4  ;;  %v2142_v24 = vmax.f32 %v2078_v52, %v2079_v54 }
 0x298   :  { %v2140_v12 = vmax.f32 %v2107_v56, %v2077_v26  ;;  %v2141_v9 = vmax.f32 %v2077_v26, %v2078_v52  ;;  %v2204_v44 = vmax.f32 %v2139_v17, %v2077_v26  ;;  %2046 = vst [vmem:[#allocation2 + $0x369] sm:$0x7f] %v1982_v46 }
 0x299   :  { %v2113_v61 = vld [vmem:[#allocation2 + $0x380] sm:$0xff] }
 0x29a   :  { %v2205_v37 = vmax.f32 %v2140_v12, %v2078_v52  ;;  %v2206_v59 = vmax.f32 %v2141_v9, %v2079_v54  ;;  %vm2236_vm1 = vcmp.eq.f32.partialorder %v2204_v44, %v4169_v15 }
 0x29b   :  { %v2563_v51 = vsel %vm2236_vm1, 1.0, %v3032_v16  ;;  %v2111_v18 = vld [vmem:[#allocation2 + $0x350] sm:$0xff] }
 0x29c   :  { %vm2237_vm2 = vcmp.eq.f32.partialorder %v2205_v37, %v4180_v43  ;;  %vm2238_vm13 = vcmp.eq.f32.partialorder %v2206_v59, %v4099_v41  ;;  %v2332_v28 = vmul.f32 %v4169_v15, %v2563_v51  ;;  %v2143_v38 = vmax.f32 %v2079_v54, %v2111_v18  ;;  %v2114_v2 = vld [vmem:[#allocation2 + $0x398] sm:$0xff] }
 0x29d   :  { %v2564_v22 = vsel %vm2237_vm2, 1.0, %v3032_v16  ;;  %v2565_v3 = vsel %vm2238_vm13, 1.0, %v3032_v16  ;;  %v2207_v1 = vmax.f32 %v2142_v24, %v2111_v18  ;;  %v2146_v42 = vmax.f32 %v2113_v61, %v2114_v2 }
 0x29e   :  { %v2333_v0 = vmul.f32 %v4180_v43, %v2564_v22  ;;  %v2334_v50 = vmul.f32 %v4099_v41, %v2565_v3  ;;  %2431 = vst [vmem:[%s4357_s6 + $0xc0] sm:$0xff] %v2332_v28 }
 0x29f   :  { %vm2239_vm14 = vcmp.eq.f32.partialorder %v2207_v1, %v4173_v34  ;;  %v2211_v43 = vmax.f32 %v2146_v42, %v3824_v14  ;;  %v2081_v41 = vld [vmem:[#allocation2 + $0x368] sm:$0xff] }
 0x2a0   :  { %2432 = vst [vmem:[%s4357_s6 + $0xc8] sm:$0xff] %v2333_v0  ;;  %2433 = vst [vmem:[%s4357_s6 + $0xd0] sm:$0xff] %v2334_v50  ;;  %v2566_v15 = vsel %vm2239_vm14, 1.0, %v3032_v16  ;;  %v2144_v48 = vmax.f32 %v2111_v18, %v2081_v41  ;;  %v2145_v21 = vmax.f32 %v2081_v41, %v2113_v61  ;;  %v2208_v11 = vmax.f32 %v2143_v38, %v2081_v41 }
 0x2a1   :  { %v2335_v53 = vmul.f32 %v4173_v34, %v2566_v15  ;;  %vm2243_vm15 = vcmp.eq.f32.partialorder %v2211_v43, %v4214_v13 }
 0x2a2   :  { %v2570_v25 = vsel %vm2243_vm15, 1.0, %v3032_v16  ;;  %v2209_v27 = vmax.f32 %v2144_v48, %v2113_v61  ;;  %v2210_v36 = vmax.f32 %v2145_v21, %v2114_v2  ;;  %vm2240_vm0 = vcmp.eq.f32.partialorder %v2208_v11, %v4203_v23 }
 0x2a3   :  { %2434 = vst [vmem:[%s4357_s6 + $0xd8] sm:$0xff] %v2335_v53  ;;  %v2339_v14 = vmul.f32 %v4214_v13, %v2570_v25  ;;  %v2567_v47 = vsel %vm2240_vm0, 1.0, %v3032_v16 }
 0x2a4   :  { %vm2241_vm3 = vcmp.eq.f32.partialorder %v2209_v27, %v4228_v49  ;;  %vm2242_vm4 = vcmp.eq.f32.partialorder %v2210_v36, %v4190_v31  ;;  %v2336_v34 = vmul.f32 %v4203_v23, %v2567_v47 }
 0x2a5   :  { %2438 = vst [vmem:[%s4357_s6 + $0xf8] sm:$0xff] %v2339_v14  ;;  %v2568_v7 = vsel %vm2241_vm3, 1.0, %v3032_v16  ;;  %v2569_v33 = vsel %vm2242_vm4, 1.0, %v3032_v16 }
 0x2a6   :  { %v2337_v55 = vmul.f32 %v4228_v49, %v2568_v7  ;;  %v2338_v13 = vmul.f32 %v4190_v31, %v2569_v33  ;;  %2435 = vst [vmem:[%s4357_s6 + $0xe0] sm:$0xff] %v2336_v34 }
 0x2a8   :  { %2436 = vst [vmem:[%s4357_s6 + $0xe8] sm:$0xff] %v2337_v55  ;;  %2437 = vst [vmem:[%s4357_s6 + $0xf0] sm:$0xff] %v2338_v13 }

</bundles_post_ra>
